<compile_context>
chip_gen: v7x
topology: tpu7x:2x2x1
jax: 0.10.0
libtpu: 0.0.40
codegen_flags: <defaults>
</compile_context>

<pallas_src>
import functools

import jax
import jax.numpy as jnp
from jax.experimental import pallas as pl
from jax.experimental.pallas import tpu as pltpu

_EPS = 1e-5


# --------------------------------- in-kernel helper ---------------------------------
def _bnrelu_conv3x3_rowmm(a_in, scale_t, shift_t, r_mat, H, W, C):
    """Folded-BN -> ReLU -> 3x3 conv (padding=1) as one row-formulation matmul.

    a_in:    (H, W*C)            f32, flat lane-dense activation
    scale_t: (1, W*C)            f32, per-channel BN scale tiled along W
    shift_t: (1, W*C)            f32, per-channel BN shift tiled along W
    r_mat:   (3*(W+2)*C, W*Cout) bf16, banded conv weights (see _band_conv_weights)
    returns: (H, W*Cout)         f32
    """
    a = jnp.maximum(a_in * scale_t + shift_t, 0.0)                    # BN + ReLU in f32
    zc = jnp.zeros((H, C), jnp.float32)
    row = jnp.concatenate([zc, a, zc], axis=1)                        # x-padded rows (H,(W+2)*C)
    zr = jnp.zeros((1, (W + 2) * C), jnp.float32)
    up = jnp.concatenate([zr, row[:H - 1, :]], axis=0)                # rows y-1 (zero top pad)
    dn = jnp.concatenate([row[1:, :], zr], axis=0)                    # rows y+1 (zero bottom pad)
    lhs = jnp.concatenate([up, row, dn], axis=1).astype(jnp.bfloat16)  # (H, 3*(W+2)*C)
    # single large-K matmul, bf16 inputs, f32 accumulation; output already lane-dense
    return jnp.dot(lhs, r_mat, preferred_element_type=jnp.float32)    # (H, W*Cout)


# --------------------------------- kernels ---------------------------------
def _conv1_shortcut_kernel(H, W, Cin,
                           x_ref, s1_ref, t1_ref, s3_ref, t3_ref,
                           r1_ref, r3_ref, b1_ref, b3_ref, cmap_ref,
                           h1_ref, res_ref, st_ref):
    """Fused: h1 = conv1(relu(bn1(x))), res = conv_sc(relu(bn3(x))), plus h1 BN2 stats."""
    x = x_ref[0].astype(jnp.float32)                                  # (H, W*Cin)

    # double_conv, first BN->ReLU->Conv; bias added once after the matmul.
    h1 = _bnrelu_conv3x3_rowmm(x, s1_ref[...], t1_ref[...], r1_ref[...], H, W, Cin)
    h1 = h1 + b1_ref[...]
    h1_ref[0] = h1                                                    # lane-dense store

    # Per-image per-channel sum / sum-of-squares of h1 (BN2 batch stats), folded across W
    # with a tiny matmul against a (W*Cout, Cout) 0/1 map -> no extra HBM pass over h1.
    cs = jnp.sum(h1, axis=0, keepdims=True)                           # (1, W*Cout)
    cq = jnp.sum(h1 * h1, axis=0, keepdims=True)                      # (1, W*Cout)
    st_ref[0] = jnp.dot(jnp.concatenate([cs, cq], axis=0), cmap_ref[...],
                        preferred_element_type=jnp.float32)           # (2, Cout)

    # shortcut BN->ReLU->Conv (shares the x tile / launch with the conv above).
    res = _bnrelu_conv3x3_rowmm(x, s3_ref[...], t3_ref[...], r3_ref[...], H, W, Cin)
    res_ref[0] = res + b3_ref[...]


def _conv2_residual_kernel(H, W, Cout,
                           h1_ref, res_ref, s2_ref, t2_ref, r2_ref, b2_ref,
                           o_ref):
    """out = conv2(relu(bn2(h1))) + bias2 + residual, all in the flat lane-dense layout."""
    h1 = h1_ref[0]                                                    # (H, W*Cout) f32
    out = _bnrelu_conv3x3_rowmm(h1, s2_ref[...], t2_ref[...], r2_ref[...], H, W, Cout)
    o_ref[0] = out + b2_ref[...] + res_ref[0]


# --------------------------------- wrapper helpers ---------------------------------
def _band_conv_weights(w_hwio, W):
    """(3,3,Cin,Cout) HWIO -> banded (3*(W+2)*Cin, W*Cout) matrix R so that
       out[h, x*Cout+o] = sum_k lhs[h, k] * R[k, x*Cout+o] reproduces the padded 3x3 conv,
       with lhs rows ordered (ky, xx, c) over the three x-padded input rows around h."""
    KH, KW, Cin, Cout = w_hwio.shape
    Wp = W + KW - 1
    r = jnp.zeros((KH, Wp, Cin, W, Cout), dtype=w_hwio.dtype)
    for x in range(W):                                                # unrolled at trace time
        r = r.at[:, x:x + KW, :, x, :].set(w_hwio)
    return r.reshape(KH * Wp * Cin, W * Cout)


def _fold_bn(gamma, beta, mean, var):
    s = gamma * jax.lax.rsqrt(var + _EPS)
    return s, beta - mean * s


def _tile_w(v, W):
    """Per-channel vector -> (1, W*C) row matching the flat (h, w*C + c) layout."""
    return jnp.tile(v.astype(jnp.float32), W).reshape(1, -1)


# --------------------------------- forward ---------------------------------
@jax.jit
def conv_residual_forward(x_nchw, p):
    """Pallas implementation of Conv_residual.forward.  Input/output are NCHW."""
    N, Cin, H, W = x_nchw.shape
    Cout = p["w1"].shape[-1]
    cnt = float(N * H * W)

    x_flat = jnp.transpose(x_nchw, (0, 2, 3, 1)).reshape(N, H, W * Cin)

    # BN1 / BN3: training-mode batch stats of x, single pass (sum + sum-of-squares).
    xs = x_flat.reshape(-1, Cin).astype(jnp.float32)
    mean_x = jnp.sum(xs, axis=0) / cnt
    var_x = jnp.maximum(jnp.sum(xs * xs, axis=0) / cnt - mean_x * mean_x, 0.0)
    s1, t1 = _fold_bn(p["bn1_g"], p["bn1_b"], mean_x, var_x)
    s3, t3 = _fold_bn(p["bn3_g"], p["bn3_b"], mean_x, var_x)

    r1 = _band_conv_weights(p["w1"], W).astype(jnp.bfloat16)          # (3*(W+2)*Cin, W*Cout)
    r3 = _band_conv_weights(p["w3"], W).astype(jnp.bfloat16)
    cmap = jnp.tile(jnp.eye(Cout, dtype=jnp.float32), (W, 1))         # (W*Cout, Cout)

    cparams = pltpu.CompilerParams(
        dimension_semantics=("parallel",),            # N=2 -> both v7x TensorCores get work
        vmem_limit_bytes=32 * 1024 * 1024)

    row_in = pl.BlockSpec((1, W * Cin), lambda n: (0, 0))
    row_out = pl.BlockSpec((1, W * Cout), lambda n: (0, 0))
    img_in = pl.BlockSpec((1, H, W * Cin), lambda n: (n, 0, 0))
    img_out = pl.BlockSpec((1, H, W * Cout), lambda n: (n, 0, 0))

    # ---- kernel A: fused conv1 + shortcut conv + BN2 statistics ----
    h1_flat, res_flat, stats = pl.pallas_call(
        functools.partial(_conv1_shortcut_kernel, H, W, Cin),
        grid=(N,),
        in_specs=[img_in,
                  row_in, row_in, row_in, row_in,
                  pl.BlockSpec(r1.shape, lambda n: (0, 0)),
                  pl.BlockSpec(r3.shape, lambda n: (0, 0)),
                  row_out, row_out,
                  pl.BlockSpec(cmap.shape, lambda n: (0, 0))],
        out_shape=(jax.ShapeDtypeStruct((N, H, W * Cout), jnp.float32),
                   jax.ShapeDtypeStruct((N, H, W * Cout), jnp.float32),
                   jax.ShapeDtypeStruct((N, 2, Cout), jnp.float32)),
        out_specs=(img_out, img_out,
                   pl.BlockSpec((1, 2, Cout), lambda n: (n, 0, 0))),
        compiler_params=cparams,
    )(x_flat,
      _tile_w(s1, W), _tile_w(t1, W), _tile_w(s3, W), _tile_w(t3, W),
      r1, r3, _tile_w(p["b1"], W), _tile_w(p["b3"], W), cmap)

    # BN2 fold from the kernel-emitted partial sums (no HBM re-read of h1).
    mean_h = jnp.sum(stats[:, 0, :], axis=0) / cnt
    var_h = jnp.maximum(jnp.sum(stats[:, 1, :], axis=0) / cnt - mean_h * mean_h, 0.0)
    s2, t2 = _fold_bn(p["bn2_g"], p["bn2_b"], mean_h, var_h)
    r2 = _band_conv_weights(p["w2"], W).astype(jnp.bfloat16)          # (3*(W+2)*Cout, W*Cout)

    # ---- kernel B: conv2 with the residual add fused ----
    out_flat = pl.pallas_call(
        functools.partial(_conv2_residual_kernel, H, W, Cout),
        grid=(N,),
        in_specs=[img_out, img_out,
                  row_out, row_out,
                  pl.BlockSpec(r2.shape, lambda n: (0, 0)),
                  row_out],
        out_shape=jax.ShapeDtypeStruct((N, H, W * Cout), jnp.float32),
        out_specs=img_out,
        compiler_params=cparams,
    )(h1_flat, res_flat, _tile_w(s2, W), _tile_w(t2, W), r2, _tile_w(p["b2"], W))

    out = out_flat.reshape(N, H, W, Cout)
    return jnp.transpose(out, (0, 3, 1, 2))                           # -> NCHW


# ----------------------- pure-JAX reference (for checking) -----------------------
def _ref_forward(x_nchw, p):
    def bn_relu(x, g, b):
        mean = jnp.mean(x, axis=(0, 2, 3), keepdims=True)
        var = jnp.mean((x - mean) ** 2, axis=(0, 2, 3), keepdims=True)
        xn = (x - mean) / jnp.sqrt(var + _EPS)
        return jnp.maximum(xn * g.reshape(1, -1, 1, 1) + b.reshape(1, -1, 1, 1), 0.0)

    def conv(x, w_hwio, b):
        w_oihw = jnp.transpose(w_hwio, (3, 2, 0, 1))
        y = jax.lax.conv_general_dilated(
            x, w_oihw, window_strides=(1, 1), padding=((1, 1), (1, 1)),
            dimension_numbers=("NCHW", "OIHW", "NCHW"))
        return y + b.reshape(1, -1, 1, 1)

    h1 = conv(bn_relu(x_nchw, p["bn1_g"], p["bn1_b"]), p["w1"], p["b1"])
    out = conv(bn_relu(h1, p["bn2_g"], p["bn2_b"]), p["w2"], p["b2"])
    res = conv(bn_relu(x_nchw, p["bn3_g"], p["bn3_b"]), p["w3"], p["b3"])
    return out + res


if __name__ == "__main__":
    N, Cin, Cout, H, W = 2, 4, 8, 16, 16
    key = jax.random.PRNGKey(0)
    ks = jax.random.split(key, 16)

    params = {
        # double_conv BN1 / Conv1
        "bn1_g": 1.0 + 0.1 * jax.random.normal(ks[0], (Cin,), jnp.float32),
        "bn1_b": 0.1 * jax.random.normal(ks[1], (Cin,), jnp.float32),
        "w1": 0.2 * jax.random.normal(ks[2], (3, 3, Cin, Cout), jnp.float32),
        "b1": 0.1 * jax.random.normal(ks[3], (Cout,), jnp.float32),
        # double_conv BN2 / Conv2
        "bn2_g": 1.0 + 0.1 * jax.random.normal(ks[4], (Cout,), jnp.float32),
        "bn2_b": 0.1 * jax.random.normal(ks[5], (Cout,), jnp.float32),
        "w2": 0.2 * jax.random.normal(ks[6], (3, 3, Cout, Cout), jnp.float32),
        "b2": 0.1 * jax.random.normal(ks[7], (Cout,), jnp.float32),
        # shortcut BN / Conv
        "bn3_g": 1.0 + 0.1 * jax.random.normal(ks[8], (Cin,), jnp.float32),
        "bn3_b": 0.1 * jax.random.normal(ks[9], (Cin,), jnp.float32),
        "w3": 0.2 * jax.random.normal(ks[10], (3, 3, Cin, Cout), jnp.float32),
        "b3": 0.1 * jax.random.normal(ks[11], (Cout,), jnp.float32),
    }

    x = jax.random.normal(ks[12], (N, Cin, H, W), jnp.float32)

    y = jax.block_until_ready(conv_residual_forward(x, params))
    y_ref = jax.block_until_ready(_ref_forward(x, params))

    assert y.shape == (N, Cout, H, W), y.shape
    # bf16 MXU inputs (f32 accumulation) -> slightly looser tolerance than a pure-f32 path.
    assert jnp.allclose(y, y_ref, rtol=5e-2, atol=5e-2), \
        float(jnp.max(jnp.abs(y - y_ref)))
    print("KERNEL_OK")
</pallas_src>

<mosaic_0001>
module attributes {stable_mosaic.version = 11 : i64} {
  func.func @_conv1_shortcut_kernel(%arg0: i32, %arg1: memref<1x16x64xf32, #tpu.memory_space<vmem>>, %arg2: memref<1x64xf32, #tpu.memory_space<vmem>>, %arg3: memref<1x64xf32, #tpu.memory_space<vmem>>, %arg4: memref<1x64xf32, #tpu.memory_space<vmem>>, %arg5: memref<1x64xf32, #tpu.memory_space<vmem>>, %arg6: memref<216x128xbf16, #tpu.memory_space<vmem>>, %arg7: memref<216x128xbf16, #tpu.memory_space<vmem>>, %arg8: memref<1x128xf32, #tpu.memory_space<vmem>>, %arg9: memref<1x128xf32, #tpu.memory_space<vmem>>, %arg10: memref<128x8xf32, #tpu.memory_space<vmem>>, %arg11: memref<1x16x128xf32, #tpu.memory_space<vmem>>, %arg12: memref<1x16x128xf32, #tpu.memory_space<vmem>>, %arg13: memref<1x2x8xf32, #tpu.memory_space<vmem>>) attributes {dimension_semantics = [#tpu.dimension_semantics<parallel>], iteration_bounds = array<i64: 2>, scalar_prefetch = 0 : i64, scratch_operands = 0 : i64, tpu.core_type = #tpu.core_type<tc>, window_params = [{transform_indices = @transform_0, window_bounds = array<i64: 1, 16, 64>}, {pipeline_mode = #tpu.pipeline_mode<synchronous>, transform_indices = @transform_1, window_bounds = array<i64: 1, 64>}, {pipeline_mode = #tpu.pipeline_mode<synchronous>, transform_indices = @transform_2, window_bounds = array<i64: 1, 64>}, {pipeline_mode = #tpu.pipeline_mode<synchronous>, transform_indices = @transform_3, window_bounds = array<i64: 1, 64>}, {pipeline_mode = #tpu.pipeline_mode<synchronous>, transform_indices = @transform_4, window_bounds = array<i64: 1, 64>}, {pipeline_mode = #tpu.pipeline_mode<synchronous>, transform_indices = @transform_5, window_bounds = array<i64: 216, 128>}, {pipeline_mode = #tpu.pipeline_mode<synchronous>, transform_indices = @transform_6, window_bounds = array<i64: 216, 128>}, {pipeline_mode = #tpu.pipeline_mode<synchronous>, transform_indices = @transform_7, window_bounds = array<i64: 1, 128>}, {pipeline_mode = #tpu.pipeline_mode<synchronous>, transform_indices = @transform_8, window_bounds = array<i64: 1, 128>}, {pipeline_mode = #tpu.pipeline_mode<synchronous>, transform_indices = @transform_9, window_bounds = array<i64: 128, 8>}, {transform_indices = @transform_10, window_bounds = array<i64: 1, 16, 128>}, {transform_indices = @transform_11, window_bounds = array<i64: 1, 16, 128>}, {transform_indices = @transform_12, window_bounds = array<i64: 1, 2, 8>}]} {
    %c0 = arith.constant 0 : index
    %c0_0 = arith.constant 0 : index
    %c0_1 = arith.constant 0 : index
    %0 = vector.load %arg1[%c0, %c0_0, %c0_1] : memref<1x16x64xf32, #tpu.memory_space<vmem>>, vector<1x16x64xf32>
    %1 = vector.shape_cast %0 : vector<1x16x64xf32> to vector<16x64xf32>
    %c0_2 = arith.constant 0 : index
    %c0_3 = arith.constant 0 : index
    %2 = vector.load %arg2[%c0_2, %c0_3] : memref<1x64xf32, #tpu.memory_space<vmem>>, vector<1x64xf32>
    %c0_4 = arith.constant 0 : index
    %c0_5 = arith.constant 0 : index
    %3 = vector.load %arg3[%c0_4, %c0_5] : memref<1x64xf32, #tpu.memory_space<vmem>>, vector<1x64xf32>
    %c0_6 = arith.constant 0 : index
    %c0_7 = arith.constant 0 : index
    %4 = vector.load %arg6[%c0_6, %c0_7] : memref<216x128xbf16, #tpu.memory_space<vmem>>, vector<216x128xbf16>
    %5 = vector.broadcast %2 : vector<1x64xf32> to vector<16x64xf32>
    %6 = arith.mulf %1, %5 : vector<16x64xf32>
    %7 = vector.broadcast %3 : vector<1x64xf32> to vector<16x64xf32>
    %8 = arith.addf %6, %7 : vector<16x64xf32>
    %cst = arith.constant 0.000000e+00 : f32
    %9 = vector.broadcast %cst : f32 to vector<16x64xf32>
    %10 = arith.maximumf %8, %9 : vector<16x64xf32>
    %cst_8 = arith.constant 0.000000e+00 : f32
    %11 = vector.broadcast %cst_8 : f32 to vector<16x4xf32>
    %12 = tpu.concatenate %11, %10, %11 in 1 : vector<16x4xf32>, vector<16x64xf32>, vector<16x4xf32> -> vector<16x72xf32>
    %cst_9 = arith.constant 0.000000e+00 : f32
    %13 = vector.broadcast %cst_9 : f32 to vector<1x72xf32>
    %14 = vector.extract_strided_slice %12 {offsets = [0, 0], sizes = [15, 72], strides = [1, 1]} : vector<16x72xf32> to vector<15x72xf32>
    %15 = tpu.concatenate %13, %14 in 0 : vector<1x72xf32>, vector<15x72xf32> -> vector<16x72xf32>
    %16 = vector.extract_strided_slice %12 {offsets = [1, 0], sizes = [15, 72], strides = [1, 1]} : vector<16x72xf32> to vector<15x72xf32>
    %17 = tpu.concatenate %16, %13 in 0 : vector<15x72xf32>, vector<1x72xf32> -> vector<16x72xf32>
    %18 = tpu.concatenate %15, %12, %17 in 1 : vector<16x72xf32>, vector<16x72xf32>, vector<16x72xf32> -> vector<16x216xf32>
    %19 = arith.truncf %18 : vector<16x216xf32> to vector<16x216xbf16>
    %cst_10 = arith.constant dense<0.000000e+00> : vector<16x128xf32>
    %20 = tpu.matmul %19, %4, %cst_10 {dimension_numbers = #tpu.dot_dimension_numbers<[1], [0], [0], [1], [0, 0, 1, 1], [], []>} : vector<16x216xbf16>, vector<216x128xbf16>, vector<16x128xf32> -> vector<16x128xf32>
    %c0_11 = arith.constant 0 : index
    %c0_12 = arith.constant 0 : index
    %21 = vector.load %arg8[%c0_11, %c0_12] : memref<1x128xf32, #tpu.memory_space<vmem>>, vector<1x128xf32>
    %22 = vector.broadcast %21 : vector<1x128xf32> to vector<16x128xf32>
    %23 = arith.addf %20, %22 : vector<16x128xf32>
    %c0_13 = arith.constant 0 : index
    %c0_14 = arith.constant 0 : index
    %c0_15 = arith.constant 0 : index
    %24 = vector.load %arg11[%c0_13, %c0_14, %c0_15] : memref<1x16x128xf32, #tpu.memory_space<vmem>>, vector<1x16x128xf32>
    %25 = vector.shape_cast %24 : vector<1x16x128xf32> to vector<16x128xf32>
    %26 = vector.shape_cast %23 : vector<16x128xf32> to vector<1x16x128xf32>
    tpu.vector_store %arg11[%c0_13, %c0_14, %c0_15], %26 {strides = array<i32>} : memref<1x16x128xf32, #tpu.memory_space<vmem>>, vector<1x16x128xf32>,
    %cst_16 = arith.constant dense<0.000000e+00> : vector<128xf32>
    %27 = vector.multi_reduction <add>, %23, %cst_16 [0] : vector<16x128xf32> to vector<128xf32>
    %28 = vector.shape_cast %27 : vector<128xf32> to vector<1x128xf32>
    %29 = arith.mulf %23, %23 : vector<16x128xf32>
    %cst_17 = arith.constant dense<0.000000e+00> : vector<128xf32>
    %30 = vector.multi_reduction <add>, %29, %cst_17 [0] : vector<16x128xf32> to vector<128xf32>
    %31 = vector.shape_cast %30 : vector<128xf32> to vector<1x128xf32>
    %32 = tpu.concatenate %28, %31 in 0 : vector<1x128xf32>, vector<1x128xf32> -> vector<2x128xf32>
    %c0_18 = arith.constant 0 : index
    %c0_19 = arith.constant 0 : index
    %33 = vector.load %arg10[%c0_18, %c0_19] : memref<128x8xf32, #tpu.memory_space<vmem>>, vector<128x8xf32>
    %cst_20 = arith.constant dense<0.000000e+00> : vector<2x8xf32>
    %34 = tpu.matmul %32, %33, %cst_20 {dimension_numbers = #tpu.dot_dimension_numbers<[1], [0], [0], [1], [0, 0, 1, 1], [], []>} : vector<2x128xf32>, vector<128x8xf32>, vector<2x8xf32> -> vector<2x8xf32>
    %c0_21 = arith.constant 0 : index
    %c0_22 = arith.constant 0 : index
    %c0_23 = arith.constant 0 : index
    %35 = vector.load %arg13[%c0_21, %c0_22, %c0_23] : memref<1x2x8xf32, #tpu.memory_space<vmem>>, vector<1x2x8xf32>
    %36 = vector.shape_cast %35 : vector<1x2x8xf32> to vector<2x8xf32>
    %37 = vector.shape_cast %34 : vector<2x8xf32> to vector<1x2x8xf32>
    tpu.vector_store %arg13[%c0_21, %c0_22, %c0_23], %37 {strides = array<i32>} : memref<1x2x8xf32, #tpu.memory_space<vmem>>, vector<1x2x8xf32>,
    %c0_24 = arith.constant 0 : index
    %c0_25 = arith.constant 0 : index
    %38 = vector.load %arg4[%c0_24, %c0_25] : memref<1x64xf32, #tpu.memory_space<vmem>>, vector<1x64xf32>
    %c0_26 = arith.constant 0 : index
    %c0_27 = arith.constant 0 : index
    %39 = vector.load %arg5[%c0_26, %c0_27] : memref<1x64xf32, #tpu.memory_space<vmem>>, vector<1x64xf32>
    %c0_28 = arith.constant 0 : index
    %c0_29 = arith.constant 0 : index
    %40 = vector.load %arg7[%c0_28, %c0_29] : memref<216x128xbf16, #tpu.memory_space<vmem>>, vector<216x128xbf16>
    %41 = vector.broadcast %38 : vector<1x64xf32> to vector<16x64xf32>
    %42 = arith.mulf %1, %41 : vector<16x64xf32>
    %43 = vector.broadcast %39 : vector<1x64xf32> to vector<16x64xf32>
    %44 = arith.addf %42, %43 : vector<16x64xf32>
    %cst_30 = arith.constant 0.000000e+00 : f32
    %45 = vector.broadcast %cst_30 : f32 to vector<16x64xf32>
    %46 = arith.maximumf %44, %45 : vector<16x64xf32>
    %cst_31 = arith.constant 0.000000e+00 : f32
    %47 = vector.broadcast %cst_31 : f32 to vector<16x4xf32>
    %48 = tpu.concatenate %47, %46, %47 in 1 : vector<16x4xf32>, vector<16x64xf32>, vector<16x4xf32> -> vector<16x72xf32>
    %cst_32 = arith.constant 0.000000e+00 : f32
    %49 = vector.broadcast %cst_32 : f32 to vector<1x72xf32>
    %50 = vector.extract_strided_slice %48 {offsets = [0, 0], sizes = [15, 72], strides = [1, 1]} : vector<16x72xf32> to vector<15x72xf32>
    %51 = tpu.concatenate %49, %50 in 0 : vector<1x72xf32>, vector<15x72xf32> -> vector<16x72xf32>
    %52 = vector.extract_strided_slice %48 {offsets = [1, 0], sizes = [15, 72], strides = [1, 1]} : vector<16x72xf32> to vector<15x72xf32>
    %53 = tpu.concatenate %52, %49 in 0 : vector<15x72xf32>, vector<1x72xf32> -> vector<16x72xf32>
    %54 = tpu.concatenate %51, %48, %53 in 1 : vector<16x72xf32>, vector<16x72xf32>, vector<16x72xf32> -> vector<16x216xf32>
    %55 = arith.truncf %54 : vector<16x216xf32> to vector<16x216xbf16>
    %cst_33 = arith.constant dense<0.000000e+00> : vector<16x128xf32>
    %56 = tpu.matmul %55, %40, %cst_33 {dimension_numbers = #tpu.dot_dimension_numbers<[1], [0], [0], [1], [0, 0, 1, 1], [], []>} : vector<16x216xbf16>, vector<216x128xbf16>, vector<16x128xf32> -> vector<16x128xf32>
    %c0_34 = arith.constant 0 : index
    %c0_35 = arith.constant 0 : index
    %57 = vector.load %arg9[%c0_34, %c0_35] : memref<1x128xf32, #tpu.memory_space<vmem>>, vector<1x128xf32>
    %58 = vector.broadcast %57 : vector<1x128xf32> to vector<16x128xf32>
    %59 = arith.addf %56, %58 : vector<16x128xf32>
    %c0_36 = arith.constant 0 : index
    %c0_37 = arith.constant 0 : index
    %c0_38 = arith.constant 0 : index
    %60 = vector.load %arg12[%c0_36, %c0_37, %c0_38] : memref<1x16x128xf32, #tpu.memory_space<vmem>>, vector<1x16x128xf32>
    %61 = vector.shape_cast %60 : vector<1x16x128xf32> to vector<16x128xf32>
    %62 = vector.shape_cast %59 : vector<16x128xf32> to vector<1x16x128xf32>
    tpu.vector_store %arg12[%c0_36, %c0_37, %c0_38], %62 {strides = array<i32>} : memref<1x16x128xf32, #tpu.memory_space<vmem>>, vector<1x16x128xf32>,
    return
  }
  func.func @transform_0(%arg0: i32) -> (i32, i32, i32) {
    %c0_i32 = arith.constant 0 : i32
    %c0_i32_0 = arith.constant 0 : i32
    %c0_i32_1 = arith.constant 0 : i32
    return %arg0, %c0_i32, %c0_i32_0 : i32, i32, i32
  }
  func.func @transform_1(%arg0: i32) -> (i32, i32) {
    %c0_i32 = arith.constant 0 : i32
    %c0_i32_0 = arith.constant 0 : i32
    %c0_i32_1 = arith.constant 0 : i32
    return %c0_i32, %c0_i32_0 : i32, i32
  }
  func.func @transform_2(%arg0: i32) -> (i32, i32) {
    %c0_i32 = arith.constant 0 : i32
    %c0_i32_0 = arith.constant 0 : i32
    %c0_i32_1 = arith.constant 0 : i32
    return %c0_i32, %c0_i32_0 : i32, i32
  }
  func.func @transform_3(%arg0: i32) -> (i32, i32) {
    %c0_i32 = arith.constant 0 : i32
    %c0_i32_0 = arith.constant 0 : i32
    %c0_i32_1 = arith.constant 0 : i32
    return %c0_i32, %c0_i32_0 : i32, i32
  }
  func.func @transform_4(%arg0: i32) -> (i32, i32) {
    %c0_i32 = arith.constant 0 : i32
    %c0_i32_0 = arith.constant 0 : i32
    %c0_i32_1 = arith.constant 0 : i32
    return %c0_i32, %c0_i32_0 : i32, i32
  }
  func.func @transform_5(%arg0: i32) -> (i32, i32) {
    %c0_i32 = arith.constant 0 : i32
    %c0_i32_0 = arith.constant 0 : i32
    %c0_i32_1 = arith.constant 0 : i32
    return %c0_i32, %c0_i32_0 : i32, i32
  }
  func.func @transform_6(%arg0: i32) -> (i32, i32) {
    %c0_i32 = arith.constant 0 : i32
    %c0_i32_0 = arith.constant 0 : i32
    %c0_i32_1 = arith.constant 0 : i32
    return %c0_i32, %c0_i32_0 : i32, i32
  }
  func.func @transform_7(%arg0: i32) -> (i32, i32) {
    %c0_i32 = arith.constant 0 : i32
    %c0_i32_0 = arith.constant 0 : i32
    %c0_i32_1 = arith.constant 0 : i32
    return %c0_i32, %c0_i32_0 : i32, i32
  }
  func.func @transform_8(%arg0: i32) -> (i32, i32) {
    %c0_i32 = arith.constant 0 : i32
    %c0_i32_0 = arith.constant 0 : i32
    %c0_i32_1 = arith.constant 0 : i32
    return %c0_i32, %c0_i32_0 : i32, i32
  }
  func.func @transform_9(%arg0: i32) -> (i32, i32) {
    %c0_i32 = arith.constant 0 : i32
    %c0_i32_0 = arith.constant 0 : i32
    %c0_i32_1 = arith.constant 0 : i32
    return %c0_i32, %c0_i32_0 : i32, i32
  }
  func.func @transform_10(%arg0: i32) -> (i32, i32, i32) {
    %c0_i32 = arith.constant 0 : i32
    %c0_i32_0 = arith.constant 0 : i32
    %c0_i32_1 = arith.constant 0 : i32
    return %arg0, %c0_i32, %c0_i32_0 : i32, i32, i32
  }
  func.func @transform_11(%arg0: i32) -> (i32, i32, i32) {
    %c0_i32 = arith.constant 0 : i32
    %c0_i32_0 = arith.constant 0 : i32
    %c0_i32_1 = arith.constant 0 : i32
    return %arg0, %c0_i32, %c0_i32_0 : i32, i32, i32
  }
  func.func @transform_12(%arg0: i32) -> (i32, i32, i32) {
    %c0_i32 = arith.constant 0 : i32
    %c0_i32_0 = arith.constant 0 : i32
    %c0_i32_1 = arith.constant 0 : i32
    return %arg0, %c0_i32, %c0_i32_0 : i32, i32, i32
  }
}

module attributes {stable_mosaic.version = 11 : i64} {
  func.func @_conv2_residual_kernel(%arg0: i32, %arg1: memref<1x16x128xf32, #tpu.memory_space<vmem>>, %arg2: memref<1x16x128xf32, #tpu.memory_space<vmem>>, %arg3: memref<1x128xf32, #tpu.memory_space<vmem>>, %arg4: memref<1x128xf32, #tpu.memory_space<vmem>>, %arg5: memref<432x128xbf16, #tpu.memory_space<vmem>>, %arg6: memref<1x128xf32, #tpu.memory_space<vmem>>, %arg7: memref<1x16x128xf32, #tpu.memory_space<vmem>>) attributes {dimension_semantics = [#tpu.dimension_semantics<parallel>], iteration_bounds = array<i64: 2>, scalar_prefetch = 0 : i64, scratch_operands = 0 : i64, tpu.core_type = #tpu.core_type<tc>, window_params = [{transform_indices = @transform_0, window_bounds = array<i64: 1, 16, 128>}, {transform_indices = @transform_1, window_bounds = array<i64: 1, 16, 128>}, {pipeline_mode = #tpu.pipeline_mode<synchronous>, transform_indices = @transform_2, window_bounds = array<i64: 1, 128>}, {pipeline_mode = #tpu.pipeline_mode<synchronous>, transform_indices = @transform_3, window_bounds = array<i64: 1, 128>}, {pipeline_mode = #tpu.pipeline_mode<synchronous>, transform_indices = @transform_4, window_bounds = array<i64: 432, 128>}, {pipeline_mode = #tpu.pipeline_mode<synchronous>, transform_indices = @transform_5, window_bounds = array<i64: 1, 128>}, {transform_indices = @transform_6, window_bounds = array<i64: 1, 16, 128>}]} {
    %c0 = arith.constant 0 : index
    %c0_0 = arith.constant 0 : index
    %c0_1 = arith.constant 0 : index
    %0 = vector.load %arg1[%c0, %c0_0, %c0_1] : memref<1x16x128xf32, #tpu.memory_space<vmem>>, vector<1x16x128xf32>
    %1 = vector.shape_cast %0 : vector<1x16x128xf32> to vector<16x128xf32>
    %c0_2 = arith.constant 0 : index
    %c0_3 = arith.constant 0 : index
    %2 = vector.load %arg3[%c0_2, %c0_3] : memref<1x128xf32, #tpu.memory_space<vmem>>, vector<1x128xf32>
    %c0_4 = arith.constant 0 : index
    %c0_5 = arith.constant 0 : index
    %3 = vector.load %arg4[%c0_4, %c0_5] : memref<1x128xf32, #tpu.memory_space<vmem>>, vector<1x128xf32>
    %c0_6 = arith.constant 0 : index
    %c0_7 = arith.constant 0 : index
    %4 = vector.load %arg5[%c0_6, %c0_7] : memref<432x128xbf16, #tpu.memory_space<vmem>>, vector<432x128xbf16>
    %5 = vector.broadcast %2 : vector<1x128xf32> to vector<16x128xf32>
    %6 = arith.mulf %1, %5 : vector<16x128xf32>
    %7 = vector.broadcast %3 : vector<1x128xf32> to vector<16x128xf32>
    %8 = arith.addf %6, %7 : vector<16x128xf32>
    %cst = arith.constant 0.000000e+00 : f32
    %9 = vector.broadcast %cst : f32 to vector<16x128xf32>
    %10 = arith.maximumf %8, %9 : vector<16x128xf32>
    %cst_8 = arith.constant 0.000000e+00 : f32
    %11 = vector.broadcast %cst_8 : f32 to vector<16x8xf32>
    %12 = tpu.concatenate %11, %10, %11 in 1 : vector<16x8xf32>, vector<16x128xf32>, vector<16x8xf32> -> vector<16x144xf32>
    %cst_9 = arith.constant 0.000000e+00 : f32
    %13 = vector.broadcast %cst_9 : f32 to vector<1x144xf32>
    %14 = vector.extract_strided_slice %12 {offsets = [0, 0], sizes = [15, 144], strides = [1, 1]} : vector<16x144xf32> to vector<15x144xf32>
    %15 = tpu.concatenate %13, %14 in 0 : vector<1x144xf32>, vector<15x144xf32> -> vector<16x144xf32>
    %16 = vector.extract_strided_slice %12 {offsets = [1, 0], sizes = [15, 144], strides = [1, 1]} : vector<16x144xf32> to vector<15x144xf32>
    %17 = tpu.concatenate %16, %13 in 0 : vector<15x144xf32>, vector<1x144xf32> -> vector<16x144xf32>
    %18 = tpu.concatenate %15, %12, %17 in 1 : vector<16x144xf32>, vector<16x144xf32>, vector<16x144xf32> -> vector<16x432xf32>
    %19 = arith.truncf %18 : vector<16x432xf32> to vector<16x432xbf16>
    %cst_10 = arith.constant dense<0.000000e+00> : vector<16x128xf32>
    %20 = tpu.matmul %19, %4, %cst_10 {dimension_numbers = #tpu.dot_dimension_numbers<[1], [0], [0], [1], [0, 0, 1, 1], [], []>} : vector<16x432xbf16>, vector<432x128xbf16>, vector<16x128xf32> -> vector<16x128xf32>
    %c0_11 = arith.constant 0 : index
    %c0_12 = arith.constant 0 : index
    %21 = vector.load %arg6[%c0_11, %c0_12] : memref<1x128xf32, #tpu.memory_space<vmem>>, vector<1x128xf32>
    %22 = vector.broadcast %21 : vector<1x128xf32> to vector<16x128xf32>
    %23 = arith.addf %20, %22 : vector<16x128xf32>
    %c0_13 = arith.constant 0 : index
    %c0_14 = arith.constant 0 : index
    %c0_15 = arith.constant 0 : index
    %24 = vector.load %arg2[%c0_13, %c0_14, %c0_15] : memref<1x16x128xf32, #tpu.memory_space<vmem>>, vector<1x16x128xf32>
    %25 = vector.shape_cast %24 : vector<1x16x128xf32> to vector<16x128xf32>
    %26 = arith.addf %23, %25 : vector<16x128xf32>
    %c0_16 = arith.constant 0 : index
    %c0_17 = arith.constant 0 : index
    %c0_18 = arith.constant 0 : index
    %27 = vector.load %arg7[%c0_16, %c0_17, %c0_18] : memref<1x16x128xf32, #tpu.memory_space<vmem>>, vector<1x16x128xf32>
    %28 = vector.shape_cast %27 : vector<1x16x128xf32> to vector<16x128xf32>
    %29 = vector.shape_cast %26 : vector<16x128xf32> to vector<1x16x128xf32>
    tpu.vector_store %arg7[%c0_16, %c0_17, %c0_18], %29 {strides = array<i32>} : memref<1x16x128xf32, #tpu.memory_space<vmem>>, vector<1x16x128xf32>,
    return
  }
  func.func @transform_0(%arg0: i32) -> (i32, i32, i32) {
    %c0_i32 = arith.constant 0 : i32
    %c0_i32_0 = arith.constant 0 : i32
    %c0_i32_1 = arith.constant 0 : i32
    return %arg0, %c0_i32, %c0_i32_0 : i32, i32, i32
  }
  func.func @transform_1(%arg0: i32) -> (i32, i32, i32) {
    %c0_i32 = arith.constant 0 : i32
    %c0_i32_0 = arith.constant 0 : i32
    %c0_i32_1 = arith.constant 0 : i32
    return %arg0, %c0_i32, %c0_i32_0 : i32, i32, i32
  }
  func.func @transform_2(%arg0: i32) -> (i32, i32) {
    %c0_i32 = arith.constant 0 : i32
    %c0_i32_0 = arith.constant 0 : i32
    %c0_i32_1 = arith.constant 0 : i32
    return %c0_i32, %c0_i32_0 : i32, i32
  }
  func.func @transform_3(%arg0: i32) -> (i32, i32) {
    %c0_i32 = arith.constant 0 : i32
    %c0_i32_0 = arith.constant 0 : i32
    %c0_i32_1 = arith.constant 0 : i32
    return %c0_i32, %c0_i32_0 : i32, i32
  }
  func.func @transform_4(%arg0: i32) -> (i32, i32) {
    %c0_i32 = arith.constant 0 : i32
    %c0_i32_0 = arith.constant 0 : i32
    %c0_i32_1 = arith.constant 0 : i32
    return %c0_i32, %c0_i32_0 : i32, i32
  }
  func.func @transform_5(%arg0: i32) -> (i32, i32) {
    %c0_i32 = arith.constant 0 : i32
    %c0_i32_0 = arith.constant 0 : i32
    %c0_i32_1 = arith.constant 0 : i32
    return %c0_i32, %c0_i32_0 : i32, i32
  }
  func.func @transform_6(%arg0: i32) -> (i32, i32, i32) {
    %c0_i32 = arith.constant 0 : i32
    %c0_i32_0 = arith.constant 0 : i32
    %c0_i32_1 = arith.constant 0 : i32
    return %arg0, %c0_i32, %c0_i32_0 : i32, i32, i32
  }
}

</mosaic_0001>

<bundles_post_ra>
// kernel: tile.58
= control target key start
LH: loop header
LB: loop body
LE: loop exit
PB: predicated region body
PF: predicated region fallthrough
CT: control target
= control target key end

     0   :  { %s28_s0 = inlined_call_operand.vmem [shape: f32[4], index: 0, kind: input, shape index: {}]   ;;  %s29_s1 = inlined_call_operand.vmem [shape: f32[16,4], index: 1, kind: output, shape index: {}]  }
   0x1   :  { %v4_v0 = vld [vmem:[%s28_s0] ss:$0 sm:$0xff] }
   0x2   :  { %5 = vst [vmem:[%s29_s1] sm:$0xff] %v4_v0  ;;  %8 = vst [vmem:[%s29_s1 + $0x8] sm:$0xff] %v4_v0 }

// kernel: tile.59
= control target key start
LH: loop header
LB: loop body
LE: loop exit
PB: predicated region body
PF: predicated region fallthrough
CT: control target
= control target key end

     0   :  { %s131_s10 = smov 60   ;;  %s132_s11 = smov 52   ;;  %vm3_vm0 = vcmask 31744   ;;  %vm9_vm1 = vcmask 523744   ;;  %vm15_vm2 = vcmask 490944   ;;  %vm21_vm3 = vcmask 458144   ;;  %s207_s0 = inlined_call_operand.vmem [shape: f32[16,4], index: 0, kind: input, shape index: {}]   ;;  %s208_s1 = inlined_call_operand.vmem [shape: f32[1,64], index: 1, kind: output, shape index: {}]  }
   0x1   :  { %v101_v0 = vld [vmem:[%s207_s0 + $0xf] sm:$0x1]   ;;  %v103_v1 = vld [vmem:[%s207_s0 + $0xd] sm:$0x1]   ;;  %v102_v2 = vld [vmem:[%s207_s0 + $0xe] sm:$0x1]  }
   0x2   :  { %7 = vrot.lane.b32.xlu0 %v101_v0, %s131_s10  ;;  %19 = vrot.lane.b32.xlu1 %v103_v1, %s132_s11  ;;  %v104_v3 = vld [vmem:[%s207_s0 + $0xc] sm:$0x1]   ;;  %s133_s16 = smov 56   ;;  %s134_s17 = smov 48   ;;  %v105_v4 = vld [vmem:[%s207_s0 + $0xb] sm:$0x1]  }
   0x3   :  { %v106_v5 = vld [vmem:[%s207_s0 + $0xa] sm:$0x1]   ;;  %v2_v6 = vld [vmem:[%s207_s0] sm:$0x1]   ;;  %s135_s24 = smov 44   ;;  %s136_s25 = smov 40  }
   0x4   :  { %4 = vst.msk [vmem:[#allocation0] sm:$0x1] %vm3_vm0, %v2_v6   ;;  %v107_v7 = vld [vmem:[%s207_s0 + $0x9] sm:$0x1]   ;;  %v108_v8 = vld [vmem:[%s207_s0 + $0x8] sm:$0x1]  }
   0x5   :  { %s137_s30 = smov 36   ;;  %s138_s2 = smov 32   ;;  %v109_v9 = vld [vmem:[%s207_s0 + $0x7] sm:$0x1]   ;;  %v110_v10 = vld [vmem:[%s207_s0 + $0x6] sm:$0x1]  }
   0x6   :  { %13 = vrot.lane.b32.xlu0 %v102_v2, %s133_s16  ;;  %25 = vrot.lane.b32.xlu1 %v104_v3, %s134_s17  ;;  %s139_s7 = smov 28   ;;  %s140_s8 = smov 24   ;;  %v111_v11 = vld [vmem:[%s207_s0 + $0x5] sm:$0x1]   ;;  %v112_v12 = vld [vmem:[%s207_s0 + $0x4] sm:$0x1]  }
   0x7   :  { %s141_s13 = smov 20   ;;  %s142_s14 = smov 16   ;;  %v113_v13 = vld [vmem:[%s207_s0 + $0x3] sm:$0x1]   ;;  %v114_v14 = vld [vmem:[%s207_s0 + $0x2] sm:$0x1]  }
   0x8   :  { %s143_s19 = smov 12   ;;  %s144_s20 = smov 8   ;;  %v115_v15 = vld [vmem:[%s207_s0 + $0x1] sm:$0x1]   ;;  %vm27_vm4 = vcmask 425344   ;;  %vm33_vm5 = vcmask 392544  }
   0x9   :  { %s145_s0 = smov 4   ;;  %vm39_vm6 = vcmask 359744   ;;  %vm45_vm7 = vcmask 326944   ;;  %vm51_vm8 = vcmask 294144   ;;  %vm57_vm9 = vcmask 261344  }
   0xa   :  { %31 = vrot.lane.b32.xlu0 %v105_v4, %s135_s24  ;;  %37 = vrot.lane.b32.xlu1 %v106_v5, %s136_s25  ;;  %vm63_vm10 = vcmask 228544   ;;  %vm69_vm11 = vcmask 195744   ;;  %vm75_vm12 = vcmask 162944   ;;  %vm81_vm13 = vcmask 130144  }
   0xb   :  { %vm87_vm14 = vcmask 97344   ;;  %vm93_vm15 = vcmask 64544  }
   0xe   :  { %43 = vrot.lane.b32.xlu0 %v107_v7, %s137_s30  ;;  %49 = vrot.lane.b32.xlu1 %v108_v8, %s138_s2 }
  0x12   :  { %55 = vrot.lane.b32.xlu0 %v109_v9, %s139_s7  ;;  %61 = vrot.lane.b32.xlu1 %v110_v10, %s140_s8 }
  0x16   :  { %67 = vrot.lane.b32.xlu0 %v111_v11, %s141_s13  ;;  %73 = vrot.lane.b32.xlu1 %v112_v12, %s142_s14 }
  0x1a   :  { %79 = vrot.lane.b32.xlu0 %v113_v13, %s143_s19  ;;  %85 = vrot.lane.b32.xlu1 %v114_v14, %s144_s20 }
  0x1e   :  { %91 = vrot.lane.b32.xlu0 %v115_v15, %s145_s0 }
  0x74   :  { %v8_v16 = vpop.permute.xlu0 %7   ;;  %v20_v17 = vpop.permute.xlu1 %19  }
  0x75   :  { %10 = vst.msk [vmem:[#allocation0] sm:$0x1] %vm9_vm1, %v8_v16  }
  0x78   :  { %v14_v18 = vpop.permute.xlu0 %13   ;;  %v26_v19 = vpop.permute.xlu1 %25  }
  0x79   :  { %16 = vst.msk [vmem:[#allocation0] sm:$0x1] %vm15_vm2, %v14_v18  }
  0x7a   :  { %22 = vst.msk [vmem:[#allocation0] sm:$0x1] %vm21_vm3, %v20_v17  }
  0x7b   :  { %28 = vst.msk [vmem:[#allocation0] sm:$0x1] %vm27_vm4, %v26_v19  }
  0x7c   :  { %v32_v20 = vpop.permute.xlu0 %31   ;;  %v38_v21 = vpop.permute.xlu1 %37  }
  0x7d   :  { %34 = vst.msk [vmem:[#allocation0] sm:$0x1] %vm33_vm5, %v32_v20  }
  0x7e   :  { %40 = vst.msk [vmem:[#allocation0] sm:$0x1] %vm39_vm6, %v38_v21  }
  0x80   :  { %v44_v22 = vpop.permute.xlu0 %43   ;;  %v50_v23 = vpop.permute.xlu1 %49  }
  0x81   :  { %46 = vst.msk [vmem:[#allocation0] sm:$0x1] %vm45_vm7, %v44_v22  }
  0x82   :  { %52 = vst.msk [vmem:[#allocation0] sm:$0x1] %vm51_vm8, %v50_v23  }
  0x84   :  { %v56_v24 = vpop.permute.xlu0 %55   ;;  %v62_v25 = vpop.permute.xlu1 %61  }
  0x85   :  { %58 = vst.msk [vmem:[#allocation0] sm:$0x1] %vm57_vm9, %v56_v24  }
  0x86   :  { %64 = vst.msk [vmem:[#allocation0] sm:$0x1] %vm63_vm10, %v62_v25  }
  0x88   :  { %v68_v26 = vpop.permute.xlu0 %67   ;;  %v74_v27 = vpop.permute.xlu1 %73  }
  0x89   :  { %70 = vst.msk [vmem:[#allocation0] sm:$0x1] %vm69_vm11, %v68_v26  }
  0x8a   :  { %76 = vst.msk [vmem:[#allocation0] sm:$0x1] %vm75_vm12, %v74_v27  }
  0x8c   :  { %v80_v28 = vpop.permute.xlu0 %79   ;;  %v86_v29 = vpop.permute.xlu1 %85  }
  0x8d   :  { %82 = vst.msk [vmem:[#allocation0] sm:$0x1] %vm81_vm13, %v80_v28  }
  0x8e   :  { %88 = vst.msk [vmem:[#allocation0] sm:$0x1] %vm87_vm14, %v86_v29  }
  0x90   :  { %v92_v30 = vpop.permute.xlu0 %91  }
  0x91   :  { %94 = vst.msk [vmem:[#allocation0] sm:$0x1] %vm93_vm15, %v92_v30  }
  0x98   :  { %v98_v31 = vld [vmem:[#allocation0] sm:$0x1] }
  0x99   :  { %100 = vst [vmem:[%s208_s1] sm:$0x1] %v98_v31 }

// kernel: tile.78
= control target key start
LH: loop header
LB: loop body
LE: loop exit
PB: predicated region body
PF: predicated region fallthrough
CT: control target
= control target key end

     0   :  { %s28_s0 = inlined_call_operand.vmem [shape: f32[8], index: 0, kind: input, shape index: {}]   ;;  %s29_s1 = inlined_call_operand.vmem [shape: f32[16,8], index: 1, kind: output, shape index: {}]  }
   0x1   :  { %v4_v0 = vld [vmem:[%s28_s0] ss:$0 sm:$0xff] }
   0x2   :  { %5 = vst [vmem:[%s29_s1] sm:$0xff] %v4_v0  ;;  %8 = vst [vmem:[%s29_s1 + $0x8] sm:$0xff] %v4_v0 }

// kernel: tile.79
= control target key start
LH: loop header
LB: loop body
LE: loop exit
PB: predicated region body
PF: predicated region fallthrough
CT: control target
= control target key end

     0   :  { %s131_s10 = smov 120   ;;  %s132_s11 = smov 104   ;;  %vm3_vm0 = vcmask 64512   ;;  %vm9_vm1 = vcmask 1048512   ;;  %vm15_vm2 = vcmask 982912   ;;  %vm21_vm3 = vcmask 917312   ;;  %s207_s0 = inlined_call_operand.vmem [shape: f32[16,8], index: 0, kind: input, shape index: {}]   ;;  %s208_s1 = inlined_call_operand.vmem [shape: f32[1,128], index: 1, kind: output, shape index: {}]  }
   0x1   :  { %v101_v0 = vld [vmem:[%s207_s0 + $0xf] sm:$0x1]   ;;  %v103_v1 = vld [vmem:[%s207_s0 + $0xd] sm:$0x1]   ;;  %v102_v2 = vld [vmem:[%s207_s0 + $0xe] sm:$0x1]  }
   0x2   :  { %7 = vrot.lane.b32.xlu0 %v101_v0, %s131_s10  ;;  %19 = vrot.lane.b32.xlu1 %v103_v1, %s132_s11  ;;  %v104_v3 = vld [vmem:[%s207_s0 + $0xc] sm:$0x1]   ;;  %s133_s16 = smov 112   ;;  %s134_s17 = smov 96   ;;  %v105_v4 = vld [vmem:[%s207_s0 + $0xb] sm:$0x1]  }
   0x3   :  { %v106_v5 = vld [vmem:[%s207_s0 + $0xa] sm:$0x1]   ;;  %v2_v6 = vld [vmem:[%s207_s0] sm:$0x1]   ;;  %s135_s24 = smov 88   ;;  %s136_s25 = smov 80  }
   0x4   :  { %4 = vst.msk [vmem:[#allocation0] sm:$0x1] %vm3_vm0, %v2_v6   ;;  %v107_v7 = vld [vmem:[%s207_s0 + $0x9] sm:$0x1]   ;;  %v108_v8 = vld [vmem:[%s207_s0 + $0x8] sm:$0x1]  }
   0x5   :  { %s137_s30 = smov 72   ;;  %s138_s2 = smov 64   ;;  %v109_v9 = vld [vmem:[%s207_s0 + $0x7] sm:$0x1]   ;;  %v110_v10 = vld [vmem:[%s207_s0 + $0x6] sm:$0x1]  }
   0x6   :  { %13 = vrot.lane.b32.xlu0 %v102_v2, %s133_s16  ;;  %25 = vrot.lane.b32.xlu1 %v104_v3, %s134_s17  ;;  %s139_s7 = smov 56   ;;  %s140_s8 = smov 48   ;;  %v111_v11 = vld [vmem:[%s207_s0 + $0x5] sm:$0x1]   ;;  %v112_v12 = vld [vmem:[%s207_s0 + $0x4] sm:$0x1]  }
   0x7   :  { %s141_s13 = smov 40   ;;  %s142_s14 = smov 32   ;;  %v113_v13 = vld [vmem:[%s207_s0 + $0x3] sm:$0x1]   ;;  %v114_v14 = vld [vmem:[%s207_s0 + $0x2] sm:$0x1]  }
   0x8   :  { %s143_s19 = smov 24   ;;  %s144_s20 = smov 16   ;;  %v115_v15 = vld [vmem:[%s207_s0 + $0x1] sm:$0x1]   ;;  %vm27_vm4 = vcmask 851712   ;;  %vm33_vm5 = vcmask 786112  }
   0x9   :  { %s145_s0 = smov 8   ;;  %vm39_vm6 = vcmask 720512   ;;  %vm45_vm7 = vcmask 654912   ;;  %vm51_vm8 = vcmask 589312   ;;  %vm57_vm9 = vcmask 523712  }
   0xa   :  { %31 = vrot.lane.b32.xlu0 %v105_v4, %s135_s24  ;;  %37 = vrot.lane.b32.xlu1 %v106_v5, %s136_s25  ;;  %vm63_vm10 = vcmask 458112   ;;  %vm69_vm11 = vcmask 392512   ;;  %vm75_vm12 = vcmask 326912   ;;  %vm81_vm13 = vcmask 261312  }
   0xb   :  { %vm87_vm14 = vcmask 195712   ;;  %vm93_vm15 = vcmask 130112  }
   0xe   :  { %43 = vrot.lane.b32.xlu0 %v107_v7, %s137_s30  ;;  %49 = vrot.lane.b32.xlu1 %v108_v8, %s138_s2 }
  0x12   :  { %55 = vrot.lane.b32.xlu0 %v109_v9, %s139_s7  ;;  %61 = vrot.lane.b32.xlu1 %v110_v10, %s140_s8 }
  0x16   :  { %67 = vrot.lane.b32.xlu0 %v111_v11, %s141_s13  ;;  %73 = vrot.lane.b32.xlu1 %v112_v12, %s142_s14 }
  0x1a   :  { %79 = vrot.lane.b32.xlu0 %v113_v13, %s143_s19  ;;  %85 = vrot.lane.b32.xlu1 %v114_v14, %s144_s20 }
  0x1e   :  { %91 = vrot.lane.b32.xlu0 %v115_v15, %s145_s0 }
  0x74   :  { %v8_v16 = vpop.permute.xlu0 %7   ;;  %v20_v17 = vpop.permute.xlu1 %19  }
  0x75   :  { %10 = vst.msk [vmem:[#allocation0] sm:$0x1] %vm9_vm1, %v8_v16  }
  0x78   :  { %v14_v18 = vpop.permute.xlu0 %13   ;;  %v26_v19 = vpop.permute.xlu1 %25  }
  0x79   :  { %16 = vst.msk [vmem:[#allocation0] sm:$0x1] %vm15_vm2, %v14_v18  }
  0x7a   :  { %22 = vst.msk [vmem:[#allocation0] sm:$0x1] %vm21_vm3, %v20_v17  }
  0x7b   :  { %28 = vst.msk [vmem:[#allocation0] sm:$0x1] %vm27_vm4, %v26_v19  }
  0x7c   :  { %v32_v20 = vpop.permute.xlu0 %31   ;;  %v38_v21 = vpop.permute.xlu1 %37  }
  0x7d   :  { %34 = vst.msk [vmem:[#allocation0] sm:$0x1] %vm33_vm5, %v32_v20  }
  0x7e   :  { %40 = vst.msk [vmem:[#allocation0] sm:$0x1] %vm39_vm6, %v38_v21  }
  0x80   :  { %v44_v22 = vpop.permute.xlu0 %43   ;;  %v50_v23 = vpop.permute.xlu1 %49  }
  0x81   :  { %46 = vst.msk [vmem:[#allocation0] sm:$0x1] %vm45_vm7, %v44_v22  }
  0x82   :  { %52 = vst.msk [vmem:[#allocation0] sm:$0x1] %vm51_vm8, %v50_v23  }
  0x84   :  { %v56_v24 = vpop.permute.xlu0 %55   ;;  %v62_v25 = vpop.permute.xlu1 %61  }
  0x85   :  { %58 = vst.msk [vmem:[#allocation0] sm:$0x1] %vm57_vm9, %v56_v24  }
  0x86   :  { %64 = vst.msk [vmem:[#allocation0] sm:$0x1] %vm63_vm10, %v62_v25  }
  0x88   :  { %v68_v26 = vpop.permute.xlu0 %67   ;;  %v74_v27 = vpop.permute.xlu1 %73  }
  0x89   :  { %70 = vst.msk [vmem:[#allocation0] sm:$0x1] %vm69_vm11, %v68_v26  }
  0x8a   :  { %76 = vst.msk [vmem:[#allocation0] sm:$0x1] %vm75_vm12, %v74_v27  }
  0x8c   :  { %v80_v28 = vpop.permute.xlu0 %79   ;;  %v86_v29 = vpop.permute.xlu1 %85  }
  0x8d   :  { %82 = vst.msk [vmem:[#allocation0] sm:$0x1] %vm81_vm13, %v80_v28  }
  0x8e   :  { %88 = vst.msk [vmem:[#allocation0] sm:$0x1] %vm87_vm14, %v86_v29  }
  0x90   :  { %v92_v30 = vpop.permute.xlu0 %91  }
  0x91   :  { %94 = vst.msk [vmem:[#allocation0] sm:$0x1] %vm93_vm15, %v92_v30  }
  0x98   :  { %v98_v31 = vld [vmem:[#allocation0] sm:$0x1] }
  0x99   :  { %100 = vst [vmem:[%s208_s1] sm:$0x1] %v98_v31 }

// kernel: conv_residual_forward.2
= control target key start
LH: loop header
LB: loop body
LE: loop exit
PB: predicated region body
PF: predicated region fallthrough
CT: control target
= control target key end

     0   :  { %s1410_s21 = smov 0   ;;  %s1658_s0 = inlined_call_operand.vmem [shape: f32[2,16,64], index: 0, kind: input, shape index: {}]   ;;  %s1659_s1 = inlined_call_operand.vmem [shape: f32[1,64], index: 1, kind: input, shape index: {}]   ;;  %s1660_s2 = inlined_call_operand.vmem [shape: f32[1,64], index: 2, kind: input, shape index: {}]   ;;  %s1661_s3 = inlined_call_operand.vmem [shape: f32[1,64], index: 3, kind: input, shape index: {}]   ;;  %s1662_s4 = inlined_call_operand.vmem [shape: f32[1,64], index: 4, kind: input, shape index: {}]   ;;  %s1663_s5 = inlined_call_operand.vmem [shape: bf16[216,128], index: 5, kind: input, shape index: {}]   ;;  %s1664_s6 = inlined_call_operand.vmem [shape: bf16[216,128], index: 6, kind: input, shape index: {}]   ;;  %s1665_s7 = inlined_call_operand.vmem [shape: f32[1,128], index: 7, kind: input, shape index: {}]   ;;  %s1666_s8 = inlined_call_operand.vmem [shape: f32[1,128], index: 8, kind: input, shape index: {}]   ;;  %s1667_s9 = inlined_call_operand.vmem [shape: f32[128,8], index: 9, kind: input, shape index: {}]   ;;  %s1668_s10 = inlined_call_operand.vmem [shape: f32[2,16,128], index: 10, kind: output, shape index: {0}]   ;;  %s1669_s11 = inlined_call_operand.vmem [shape: f32[2,16,128], index: 11, kind: output, shape index: {1}]   ;;  %s1670_s12 = inlined_call_operand.vmem [shape: f32[2,2,8], index: 12, kind: output, shape index: {2}]  }
   0x1 LB: > { %s1128_s22 = sadd.s32 4294967295, %s1336_s21   ;;  %p1132_p0 = scmp.ge.s32.totalorder %s1336_s21, 1  ;;  %s1336_s21 = sphi %s1410_s21, %s23_s21  }
   0x2   : > { %p367_p1 = scmp.lt.s32.totalorder %s1336_s21, 3 }
   0x4   : > { %p368_p2 = pnand %p1132_p0, %p367_p1 }
   0x5   : > { %p418_p3 = scmp.lt.s32.totalorder (!%p368_p2), %s1128_s22, 1  ;;  %v1140_v0 = vld [vmem:[%s1659_s1] ss:$0 sm:$0xff] (!%p368_p2)  ;;  %s1338_s17 = smov (!%p368_p2), 4   ;;  %v1339_v21 = vmov (!%p368_p2), 0   ;;  %v1303_v22 = vld [vmem:[%s1663_s5 + $0x8] sm:$0xff] (!%p368_p2)  }
   0x6   : > { %371 = sbr.rel (%p368_p2) target bundleno = 717 (0x2cd), region = 60  ;;  %v1158_v1 = vld [vmem:[%s1661_s3] ss:$0 sm:$0xff] (!%p368_p2)  ;;  %633 = vmatprep.subr.bf16.mxu0 (!%p368_p2), %v1339_v21  ;;  %966 = vmatprep.subr.bf16.mxu1 (!%p368_p2), %v1339_v21  ;;  %v1304_v23 = vld [vmem:[%s1663_s5 + $0x10] sm:$0xff] (!%p368_p2)   ;;  %v1305_v24 = vld [vmem:[%s1663_s5 + $0x18] sm:$0xff] (!%p368_p2)   ;;  %vm629_vm0 = vcmask (!%p368_p2), 1043456  }
   0x7   : > { %v1141_v2 = vld [vmem:[%s1660_s2] ss:$0 sm:$0xff] (!%p368_p2)  ;;  %v1307_v26 = vld [vmem:[%s1663_s5 + $0x28] sm:$0xff] (!%p368_p2)   ;;  %v1308_v27 = vld [vmem:[%s1663_s5 + $0x30] sm:$0xff] (!%p368_p2)   ;;  %vm495_vm1 = vcmask (!%p368_p2), 31744   ;;  %vm498_vm2 = vcmask (!%p368_p2), 556032  }
   0x8   : > { %v1159_v11 = vld [vmem:[%s1662_s4] ss:$0 sm:$0xff] (!%p368_p2)  ;;  %v1309_v28 = vld [vmem:[%s1663_s5 + $0x38] sm:$0xff] (!%p368_p2)   ;;  %v1311_v30 = vld [vmem:[%s1663_s5 + $0x48] sm:$0xff] (!%p368_p2)   ;;  %vm510_vm3 = vcmask (!%p368_p2), 1046528   ;;  %vm503_vm4 = vcmask (!%p368_p2), 1040384  }
   0x9   : > { %v1302_v20 = vld [vmem:[%s1663_s5] sm:$0xff] (!%p368_p2)   ;;  %v1312_v31 = vld [vmem:[%s1663_s5 + $0x50] sm:$0xff] (!%p368_p2)   ;;  %v1313_v32 = vld [vmem:[%s1663_s5 + $0x58] sm:$0xff] (!%p368_p2)   ;;  %s1340_s18 = smov (!%p368_p2), 72   ;;  %s1341_s19 = smov (!%p368_p2), 16   ;;  %vm529_vm5 = vcmask (!%p368_p2), 588800  }
   0xa   : > { %634 = vmatpush1.bf16.msra.mxu0 (!%p368_p2), %v1302_v20  ;;  %v1306_v25 = vld [vmem:[%s1663_s5 + $0x20] sm:$0xff] (!%p368_p2)   ;;  %v1315_v34 = vld [vmem:[%s1663_s5 + $0x68] ss:$0 sps:$4 sm:$0xff] (!%p368_p2)   ;;  %v1318_v54 = vld [vmem:[%s1664_s6 + $0x10] sm:$0xff] (!%p368_p2)   ;;  %vm532_vm6 = vcmask (!%p368_p2), 130048   ;;  %vm625_vm7 = vcmask (!%p368_p2), 719872  }
   0xb   : > { %635 = vmatprep.subr.bf16.mxu0 (!%p368_p2), %v1339_v21  ;;  %v1310_v29 = vld [vmem:[%s1663_s5 + $0x40] sm:$0xff] (!%p368_p2)   ;;  %v631_v36 = vsel (!%p368_p2), %vm629_vm0, %v1315_v34, 0  ;;  %v1317_v53 = vld [vmem:[%s1664_s6 + $0x8] sm:$0xff] (!%p368_p2)   ;;  %v1319_v55 = vld [vmem:[%s1664_s6 + $0x18] sm:$0xff] (!%p368_p2)   ;;  %vm1343_vm8 = vmmov (!%p368_p2), 0   ;;  %vm779_vm9 = vcmask (!%p368_p2), 58368  }
   0xc   : > { %v1314_v33 = vld [vmem:[%s1663_s5 + $0x60] sm:$0xff] (!%p368_p2)   ;;  %v1321_v57 = vld [vmem:[%s1664_s6 + $0x28] sm:$0xff] (!%p368_p2)   ;;  %v1322_v58 = vld [vmem:[%s1664_s6 + $0x30] sm:$0xff] (!%p368_p2)  }
   0xd   : > { %s1672_s22 = smov (!%p418_p3, %s1128_s22), 1  ;;  %v1316_v52 = vld [vmem:[%s1664_s6] sm:$0xff]   ;;  %v1323_v59 = vld [vmem:[%s1664_s6 + $0x38] sm:$0xff]   ;;  %v1325_v61 = vld [vmem:[%s1664_s6 + $0x48] sm:$0xff]  }
   0xe   : > { %s1427_s27 = sshll.u32 %s1672_s22, 4  ;;  %636 = vmatpush1.bf16.msra.mxu0 %v1303_v22  ;;  %967 = vmatpush1.bf16.msra.mxu1 %v1316_v52  ;;  %v1320_v56 = vld [vmem:[%s1664_s6 + $0x20] sm:$0xff]   ;;  %v1326_v62 = vld [vmem:[%s1664_s6 + $0x50] sm:$0xff]   ;;  %v1327_v63 = vld [vmem:[%s1664_s6 + $0x58] sm:$0xff]  }
   0xf   : > { %s422_s14 = scalar_lea.vmem %s1658_s0, %s1427_s27  ;;  %637 = vmatprep.subr.bf16.mxu0 %v1339_v21  ;;  %968 = vmatprep.subr.bf16.mxu1 %v1339_v21  ;;  %v1324_v60 = vld [vmem:[%s1664_s6 + $0x40] sm:$0xff]   ;;  %v706_v52 = vld [vmem:[%s1667_s9 + $0x68] sm:$0xff]  ;;  %s427_s13 = scalar_lea.vmem %s1668_s10, %s1427_s27 }
  0x10   : > { %v438_v3 = vld [vmem:[%s422_s14] sm:$0xff]  ;;  %v439_v4 = vld [vmem:[%s422_s14 + $0x8] sm:$0xff]  ;;  %s432_s20 = scalar_lea.vmem %s1669_s11, %s1427_s27 }
  0x11   : > { %v475_v5 = vmul.f32 %v1140_v0, %v438_v3  ;;  %v476_v6 = vmul.f32 %v1140_v0, %v439_v4  ;;  %v816_v7 = vmul.f32 %v1158_v1, %v438_v3  ;;  %v817_v8 = vmul.f32 %v1158_v1, %v439_v4  ;;  %v1328_v4 = vld [vmem:[%s1664_s6 + $0x60] sm:$0xff]  }
  0x12   : > { %638 = vmatpush1.bf16.msra.mxu0 %v1304_v23  ;;  %969 = vmatpush1.bf16.msra.mxu1 %v1317_v53  ;;  %v693_v23 = vld [vmem:[%s1667_s9] sm:$0xff]  ;;  %v707_v53 = vld [vmem:[%s1667_s9 + $0x70] sm:$0xff] }
  0x13   : > { %v483_v9 = vadd.f32 %v1141_v2, %v475_v5  ;;  %v484_v10 = vadd.f32 %v1141_v2, %v476_v6  ;;  %v824_v12 = vadd.f32 %v1159_v11, %v816_v7  ;;  %v825_v13 = vadd.f32 %v1159_v11, %v817_v8  ;;  %639 = vmatprep.subr.bf16.mxu0 %v1339_v21  ;;  %v1329_v11 = vld [vmem:[%s1664_s6 + $0x68] ss:$0 sps:$4 sm:$0xff]  }
  0x14   : > { %970 = vmatprep.subr.bf16.mxu1 %v1339_v21 }
  0x15   : > { %v485_v14 = vmax.f32 %v483_v9, 0.0  ;;  %v486_v15 = vmax.f32 %v484_v10, 0.0  ;;  %v826_v16 = vmax.f32 %v824_v12, 0.0  ;;  %v827_v17 = vmax.f32 %v825_v13, 0.0 }
  0x16   : > { %640 = vmatpush1.bf16.msra.mxu0 %v1305_v24  ;;  %971 = vmatpush1.bf16.msra.mxu1 %v1318_v54  ;;  %v694_v24 = vld [vmem:[%s1667_s9 + $0x8] sm:$0xff] }
  0x17   : > { %v1272_v18 = vpack.i.bf16 %v486_v15, %v485_v14  ;;  %v1439_v19 = vpack.i.bf16 %v827_v17, %v826_v16  ;;  %641 = vmatprep.subr.bf16.mxu0 %v1339_v21  ;;  %972 = vmatprep.subr.bf16.mxu1 %v1339_v21  ;;  %v964_v16 = vsel %vm629_vm0, %v1329_v11, 0 }
  0x19   : > { %1273 = vrot.lane.b32.xlu0 %v1272_v18, %s1338_s17 }
  0x1a   : > { %642 = vmatpush1.bf16.msra.mxu0 %v1306_v25  ;;  %973 = vmatpush1.bf16.msra.mxu1 %v1319_v55  ;;  %v708_v55 = vld [vmem:[%s1667_s9 + $0x78] sm:$0xff] }
  0x1b   : > { %643 = vmatprep.subr.bf16.mxu0 %v1339_v21  ;;  %974 = vmatprep.subr.bf16.mxu1 %v1339_v21 }
  0x1e   : > { %644 = vmatpush1.bf16.msra.mxu0 %v1307_v26  ;;  %975 = vmatpush1.bf16.msra.mxu1 %v1320_v56  ;;  %v1344_v56 = vmov 0.0  }
  0x1f   : > { %645 = vmatprep.subr.bf16.mxu0 %v1339_v21  ;;  %976 = vmatprep.subr.bf16.mxu1 %v1339_v21 }
  0x22   : > { %646 = vmatpush1.bf16.msra.mxu0 %v1308_v27  ;;  %977 = vmatpush1.bf16.msra.mxu1 %v1321_v57  ;;  %v1255_v57 = vpack.c.bf16 %v708_v55, %v707_v53 }
  0x23   : > { %647 = vmatprep.subr.bf16.mxu0 %v1339_v21  ;;  %978 = vmatprep.subr.bf16.mxu1 %v1339_v21 }
  0x26   : > { %648 = vmatpush1.bf16.msra.mxu0 %v1309_v28  ;;  %979 = vmatpush1.bf16.msra.mxu1 %v1322_v58 }
  0x27   : > { %649 = vmatprep.subr.bf16.mxu0 %v1339_v21  ;;  %980 = vmatprep.subr.bf16.mxu1 %v1339_v21 }
  0x2a   : > { %650 = vmatpush1.bf16.msra.mxu0 %v1310_v29  ;;  %981 = vmatpush1.bf16.msra.mxu1 %v1323_v59  ;;  %v1342_v29 = vmov 0.0|0.0  }
  0x2b   : > { %651 = vmatprep.subr.bf16.mxu0 %v1339_v21  ;;  %982 = vmatprep.subr.bf16.mxu1 %v1339_v21 }
  0x2e   : > { %652 = vmatpush1.bf16.msra.mxu0 %v1311_v30  ;;  %983 = vmatpush1.bf16.msra.mxu1 %v1324_v60  ;;  %v695_v30 = vld [vmem:[%s1667_s9 + $0x10] sm:$0xff] }
  0x2f   : > { %653 = vmatprep.subr.bf16.mxu0 %v1339_v21  ;;  %984 = vmatprep.subr.bf16.mxu1 %v1339_v21 }
  0x32   : > { %654 = vmatpush1.bf16.msra.mxu0 %v1312_v31  ;;  %985 = vmatpush1.bf16.msra.mxu1 %v1325_v61  ;;  %v696_v31 = vld [vmem:[%s1667_s9 + $0x18] sm:$0xff] }
  0x33   : > { %655 = vmatprep.subr.bf16.mxu0 %v1339_v21  ;;  %986 = vmatprep.subr.bf16.mxu1 %v1339_v21 }
  0x36   : > { %656 = vmatpush1.bf16.msra.mxu0 %v1313_v32  ;;  %987 = vmatpush1.bf16.msra.mxu1 %v1326_v62 }
  0x37   : > { %657 = vmatprep.subr.bf16.mxu0 %v1339_v21  ;;  %988 = vmatprep.subr.bf16.mxu1 %v1339_v21 }
  0x3a   : > { %658 = vmatpush1.bf16.msra.mxu0 %v1314_v33  ;;  %989 = vmatpush1.bf16.msra.mxu1 %v1327_v63  ;;  %v1234_v33 = vpack.c.bf16 %v694_v24, %v693_v23 }
  0x3b   : > { %659 = vmatprep.subr.bf16.mxu0 %v1339_v21  ;;  %990 = vmatprep.subr.bf16.mxu1 %v1339_v21 }
  0x3e   : > { %660 = vmatpush1.bf16.msra.mxu0 %v631_v36  ;;  %991 = vmatpush1.bf16.msra.mxu1 %v1328_v4 }
  0x3f   : > { %992 = vmatprep.subr.bf16.mxu1 %v1339_v21  ;;  %1233 = vmatprep.subr.bf16.mxu0 %v1342_v29 }
  0x42   : > { %993 = vmatpush1.bf16.msra.mxu1 %v964_v16 }
  0x8b   : > { %v1274_v35 = vpop.permute.xlu0 %1273 }
  0x8c   : > { %v1276_v37 = vunpack.i.h.bf16 %v1274_v35  ;;  %v1275_v38 = vunpack.i.l.bf16 %v1274_v35 }
  0x8e   : > { %v497_v39 = vsel %vm495_vm1, 0.0, %v1276_v37  ;;  %v496_v40 = vsel %vm495_vm1, 0.0, %v1275_v38  ;;  %v1237_v37 = vpack.c.bf16 %v696_v31, %v695_v30  ;;  %v1160_v31 = vld [vmem:[%s1666_s8] ss:$0 sm:$0xff] }
  0x8f   : > { %v500_v41 = vsel %vm498_vm2, %v497_v39, 0.0  ;;  %v499_v42 = vsel %vm498_vm2, %v496_v40, 0.0  ;;  %v697_v39 = vld [vmem:[%s1667_s9 + $0x20] sm:$0xff]  ;;  %v698_v40 = vld [vmem:[%s1667_s9 + $0x28] sm:$0xff] }
  0x90   : > { %v505_v43 = vrot.slane %v500_v41, 7  ;;  %v504_v44 = vrot.slane %v499_v42, 7  ;;  %v1277_v45 = vpack.i.bf16 %v500_v41, %v499_v42  ;;  %v511_v46 = vrot.slane %v499_v42, 1  ;;  %v699_v42 = vld [vmem:[%s1667_s9 + $0x30] sm:$0xff] }
  0x91   : > { %v512_v47 = vrot.slane %v500_v41, 1  ;;  %v1240_v41 = vpack.c.bf16 %v698_v40, %v697_v39 }
  0x92   : > { %1278 = vrot.lane.b32.xlu0 %v1277_v45, %s1340_s18  ;;  %v506_v48 = vsel %vm503_vm4, %v504_v44, %v505_v43  ;;  %v509_v3 = vsel %vm503_vm4, 0.0, %v504_v44  ;;  %v700_v43 = vld [vmem:[%s1667_s9 + $0x38] sm:$0xff]  ;;  %v701_v45 = vld [vmem:[%s1667_s9 + $0x40] sm:$0xff] }
  0x93   : > { %v513_v49 = vsel %vm510_vm3, %v511_v46, %v512_v47  ;;  %v515_v50 = vsel %vm510_vm3, %v512_v47, 0.0  ;;  %v1243_v44 = vpack.c.bf16 %v700_v43, %v699_v42  ;;  %v702_v46 = vld [vmem:[%s1667_s9 + $0x48] sm:$0xff] }
  0x94   : > { %v1282_v51 = vpack.i.bf16 %v515_v50, %v513_v49  ;;  %v1246_v47 = vpack.c.bf16 %v702_v46, %v701_v45  ;;  %v704_v49 = vld [vmem:[%s1667_s9 + $0x58] sm:$0xff] }
  0x96   : > { %1283 = vrot.lane.b32.xlu1 %v1282_v51, %s1341_s19  ;;  %v705_v51 = vld [vmem:[%s1667_s9 + $0x60] sm:$0xff] }
  0x97   : > { %v1252_v54 = vpack.c.bf16 %v706_v52, %v705_v51 }
  0x9a   : > { %1288 = vrot.lane.b32.xlu1 %v1439_v19, %s1338_s17 }
 0x104   : > { %v1279_v0 = vpop.permute.xlu0 %1278 }
 0x105   : > { %v1281_v1 = vunpack.i.h.bf16 %v1279_v0  ;;  %v1280_v2 = vunpack.i.l.bf16 %v1279_v0 }
 0x107   : > { %v530_v5 = vsel %vm529_vm5, %v509_v3, %v1280_v2  ;;  %v531_v6 = vsel %vm529_vm5, %v506_v48, %v1281_v1  ;;  %v703_v48 = vld [vmem:[%s1667_s9 + $0x50] sm:$0xff] }
 0x108   : > { %v1284_v7 = vpop.permute.xlu1 %1283  ;;  %v535_v8 = vpack.c.bf16 %v531_v6, %v530_v5  ;;  %v1249_v50 = vpack.c.bf16 %v704_v49, %v703_v48 }
 0x109   : > { %v1286_v9 = vunpack.i.h.bf16 %v1284_v7  ;;  %v1285_v10 = vunpack.i.l.bf16 %v1284_v7  ;;  %v1142_v7 = vld [vmem:[%s1665_s7] ss:$0 sm:$0xff] }
 0x10b   : > { %v533_v12 = vsel %vm532_vm6, %v1280_v2, %v1285_v10  ;;  %v534_v13 = vsel %vm532_vm6, %v1281_v1, %v1286_v9 }
 0x10c   : > { %v1289_v14 = vpop.permute.xlu1 %1288  ;;  %v536_v15 = vpack.c.bf16 %v534_v13, %v533_v12 }
 0x10d   : > { %v1291_v17 = vunpack.i.h.bf16 %v1289_v14  ;;  %v1290_v18 = vunpack.i.l.bf16 %v1289_v14 }
 0x10e   : > { %1157 = vmatprep.mubr.msk.bf16.mxu0 %vm625_vm7, %v536_v15 }
 0x10f   : > { %v837_v19 = vsel %vm495_vm1, 0.0, %v1291_v17  ;;  %v836_v20 = vsel %vm495_vm1, 0.0, %v1290_v18  ;;  %666 = vmatmul.mubr.bf16.vlgmr.msra.gmra.mrb[0].mxu0 %v535_v8 }
 0x110   : > { %v839_v21 = vsel %vm498_vm2, %v837_v19, 0.0  ;;  %v838_v22 = vsel %vm498_vm2, %v836_v20, 0.0  ;;  %1235 = vmatpush3.bf16.msra.mxu0 %v1234_v33  ;;  %1230 = vmatprep.mubr.msk.f32.mxu0 %vm1343_vm8, %v1344_v56 }
 0x111   : > { %v843_v25 = vrot.slane %v839_v21, 7  ;;  %v842_v26 = vrot.slane %v838_v22, 7  ;;  %v848_v27 = vrot.slane %v838_v22, 1  ;;  %v1292_v28 = vpack.i.bf16 %v839_v21, %v838_v22  ;;  %1236 = vmatprep.subr.bf16.mxu0 %v1342_v29 }
 0x112   : > { %v849_v32 = vrot.slane %v839_v21, 1 }
 0x113   : > { %1293 = vrot.lane.b32.xlu0 %v1292_v28, %s1340_s18  ;;  %v844_v34 = vsel %vm503_vm4, %v842_v26, %v843_v25  ;;  %v847_v61 = vsel %vm503_vm4, 0.0, %v842_v26  ;;  %s1139_s18 = sshll.u32 %s1672_s22, 1 }
 0x114   : > { %v850_v35 = vsel %vm510_vm3, %v848_v27, %v849_v32  ;;  %v852_v36 = vsel %vm510_vm3, %v849_v32, 0.0  ;;  %1238 = vmatpush3.bf16.msra.mxu0 %v1237_v37  ;;  %s436_s25 = scalar_lea.vmem %s1670_s12, %s1139_s18 }
 0x115   : > { %v1297_v38 = vpack.i.bf16 %v852_v36, %v850_v35  ;;  %1239 = vmatprep.subr.bf16.mxu0 %v1342_v29 }
 0x117   : > { %1298 = vrot.lane.b32.xlu1 %v1297_v38, %s1341_s19 }
 0x118   : > { %1241 = vmatpush3.bf16.msra.mxu0 %v1240_v41 }
 0x119   : > { %1242 = vmatprep.subr.bf16.mxu0 %v1342_v29 }
 0x11c   : > { %1244 = vmatpush3.bf16.msra.mxu0 %v1243_v44 }
 0x11d   : > { %1245 = vmatprep.subr.bf16.mxu0 %v1342_v29 }
 0x120   : > { %1247 = vmatpush3.bf16.msra.mxu0 %v1246_v47 }
 0x121   : > { %1248 = vmatprep.subr.bf16.mxu0 %v1342_v29 }
 0x124   : > { %1250 = vmatpush3.bf16.msra.mxu0 %v1249_v50 }
 0x125   : > { %1251 = vmatprep.subr.bf16.mxu0 %v1342_v29 }
 0x128   : > { %1253 = vmatpush3.bf16.msra.mxu0 %v1252_v54 }
 0x129   : > { %1254 = vmatprep.subr.bf16.mxu0 %v1342_v29 }
 0x12c   : > { %1256 = vmatpush3.bf16.msra.mxu0 %v1255_v57 }
 0x185   : > { %v1294_v58 = vpop.permute.xlu0 %1293 }
 0x186   : > { %v1296_v59 = vunpack.i.h.bf16 %v1294_v58  ;;  %v1295_v60 = vunpack.i.l.bf16 %v1294_v58 }
 0x188   : > { %v866_v62 = vsel %vm529_vm5, %v847_v61, %v1295_v60  ;;  %v867_v63 = vsel %vm529_vm5, %v844_v34, %v1296_v59 }
 0x189   : > { %v1299_v0 = vpop.permute.xlu1 %1298  ;;  %v870_v1 = vpack.c.bf16 %v867_v63, %v866_v62 }
 0x18a   : > { %v1301_v2 = vunpack.i.h.bf16 %v1299_v0  ;;  %v1300_v3 = vunpack.i.l.bf16 %v1299_v0 }
 0x18c   : > { %v868_v4 = vsel %vm532_vm6, %v1295_v60, %v1300_v3  ;;  %v869_v5 = vsel %vm532_vm6, %v1296_v59, %v1301_v2 }
 0x18d   : > { %v871_v6 = vpack.c.bf16 %v869_v5, %v868_v4 }
 0x18f   : > { %1175 = vmatprep.mubr.msk.bf16.mxu1 %vm625_vm7, %v871_v6 }
 0x190   : > { %999 = vmatmul.mubr.bf16.vlgmr.msra.gmra.mrb[0].mxu1 %v870_v1 }
 0x1e2   : > { %v667_v8 = vpop.f32.mrb[0].mxu0 }
 0x1e3   : > { %v668_v9 = vadd.f32 %v1142_v7, %v667_v8  ;;  %v669_v10 = vpop.f32.mrb[1].mxu0 }
 0x1e4   : > { %v670_v11 = vpop.f32.mrb[2].mxu0 }
 0x1e5   : > { %674 = vst [vmem:[%s427_s13] sm:$0xff] %v668_v9  ;;  %v671_v12 = vadd.f32 %v1142_v7, %v670_v11  ;;  %v672_v13 = vpop.f32.mrb[3].mxu0  ;;  %v683_v14 = vmul.f32 %v668_v9, %v668_v9 }
 0x1e7   : > { %675 = vst [vmem:[%s427_s13 + $0x8] sm:$0xff] %v671_v12  ;;  %v676_v15 = vadd.f32 %v671_v12, %v668_v9  ;;  %v684_v16 = vmul.f32 %v671_v12, %v671_v12 }
 0x1e9   : > { %v677_v17 = vrot.slane %v676_v15, 4  ;;  %v685_v18 = vadd.f32 %v684_v16, %v683_v14 }
 0x1eb   : > { %v678_v19 = vadd.f32 %v677_v17, %v676_v15  ;;  %v686_v20 = vrot.slane %v685_v18, 4 }
 0x1ed   : > { %v679_v21 = vrot.slane %v678_v19, 2  ;;  %v687_v22 = vadd.f32 %v686_v20, %v685_v18 }
 0x1ef   : > { %v680_v23 = vadd.f32 %v679_v21, %v678_v19  ;;  %v688_v24 = vrot.slane %v687_v22, 2 }
 0x1f1   : > { %v681_v25 = vrot.slane %v680_v23, 1  ;;  %v689_v26 = vadd.f32 %v688_v24, %v687_v22 }
 0x1f3   : > { %v690_v27 = vrot.slane %v689_v26, 1  ;;  %v682_v28 = vadd.f32 %v681_v25, %v680_v23 }
 0x1f5   : > { %v691_v29 = vadd.f32 %v690_v27, %v689_v26 }
 0x1f7   : > { %v692_v30 = vsel %vm503_vm4, %v682_v28, %v691_v29 }
 0x1f8   : > { %1231 = vmatmul.mubr.f32.vlgmr.msra.gmra.mrb[4].mxu0 %v692_v30 }
 0x263   : > { %v1000_v32 = vpop.f32.mrb[0].mxu1 }
 0x264   : > { %v1001_v33 = vadd.f32 %v1160_v31, %v1000_v32  ;;  %v1002_v34 = vpop.f32.mrb[1].mxu1 }
 0x265   : > { %v1003_v35 = vpop.f32.mrb[2].mxu1 }
 0x266   : > { %1007 = vst [vmem:[%s432_s20] sm:$0xff] %v1001_v33  ;;  %v1004_v36 = vadd.f32 %v1160_v31, %v1003_v35  ;;  %v1005_v37 = vpop.f32.mrb[3].mxu1 }
 0x268   : > { %1008 = vst [vmem:[%s432_s20 + $0x8] sm:$0xff] %v1004_v36 }
 0x2cb   : > { %v775_v38 = vpop.f32.mrb[4].mxu0 }
 0x2cc   : > { %780 = vst.msk [vmem:[%s436_s25] sm:$0x3] %vm779_vm9, %v775_v38  ;;  %v1232_v39 = vpop.f32.mrb[5].mxu0 }
 0x2cd PF: > { %s23_s21 = sadd.s32 1, %s1336_s21  }
 0x2ce   : > { %p20_p4 = scmp.ge.s32.totalorder %s23_s21, 4  }
 0x2d0   :  { %22 = sbr.rel (!%p20_p4) target bundleno = 1 (0x1), region = 114 }

// kernel: conv_residual_forward.3
= control target key start
LH: loop header
LB: loop body
LE: loop exit
PB: predicated region body
PF: predicated region fallthrough
CT: control target
= control target key end

     0   :  { %s944_s21 = smov 0   ;;  %s1075_s0 = inlined_call_operand.vmem [shape: f32[2,16,128], index: 0, kind: input, shape index: {}]   ;;  %s1076_s1 = inlined_call_operand.vmem [shape: f32[2,16,128], index: 1, kind: input, shape index: {}]   ;;  %s1077_s2 = inlined_call_operand.vmem [shape: f32[1,128], index: 2, kind: input, shape index: {}]   ;;  %s1078_s3 = inlined_call_operand.vmem [shape: f32[1,128], index: 3, kind: input, shape index: {}]   ;;  %s1079_s4 = inlined_call_operand.vmem [shape: bf16[432,128], index: 4, kind: input, shape index: {}]   ;;  %s1080_s5 = inlined_call_operand.vmem [shape: f32[1,128], index: 5, kind: input, shape index: {}]   ;;  %s1081_s6 = inlined_call_operand.vmem [shape: f32[2,16,128], index: 6, kind: output, shape index: {}]  }
   0x1 LB: > { %s758_s22 = sadd.s32 4294967295, %s902_s21   ;;  %p762_p0 = scmp.ge.s32.totalorder %s902_s21, 1  ;;  %s902_s21 = sphi %s944_s21, %s16_s21  }
   0x2   : > { %p222_p1 = scmp.lt.s32.totalorder %s902_s21, 3 }
   0x4   : > { %p223_p2 = pnand %p762_p0, %p222_p1 }
   0x5   : > { %p257_p3 = scmp.lt.s32.totalorder (!%p223_p2), %s758_s22, 1  ;;  %v769_v0 = vld [vmem:[%s1077_s2] ss:$0 sm:$0xff] (!%p223_p2)  ;;  %v904_v13 = vmov (!%p223_p2), 0   ;;  %v874_v15 = vld [vmem:[%s1079_s4 + $0x48] sm:$0xff] (!%p223_p2)   ;;  %s905_s15 = smov (!%p223_p2), 8  }
   0x6   : > { %226 = sbr.rel (%p223_p2) target bundleno = 492 (0x1ec), region = 44  ;;  %v770_v1 = vld [vmem:[%s1078_s3] ss:$0 sm:$0xff] (!%p223_p2)  ;;  %644 = vmatprep.subr.bf16.mxu1 (!%p223_p2), %v904_v13  ;;  %v870_v16 = vld [vmem:[%s1079_s4 + $0x88] sm:$0xff] (!%p223_p2)   ;;  %v877_v18 = vld [vmem:[%s1079_s4 + $0x50] sm:$0xff] (!%p223_p2)   ;;  %vm357_vm0 = vcmask (!%p223_p2), 64512  }
   0x7   : > { %v869_v11 = vld [vmem:[%s1079_s4 + $0x80] sm:$0xff] (!%p223_p2)   ;;  %v875_v17 = vld [vmem:[%s1079_s4 + $0x8] sm:$0xff] (!%p223_p2)   ;;  %v873_v19 = vld [vmem:[%s1079_s4 + $0x90] sm:$0xff] (!%p223_p2)   ;;  %vm379_vm1 = vcmask (!%p223_p2), 1046528   ;;  %vm366_vm2 = vcmask (!%p223_p2), 1040384   ;;  %s906_s18 = smov (!%p223_p2), 16  }
   0x8   : > { %v871_v12 = vld [vmem:[%s1079_s4 + $0x40] sm:$0xff] (!%p223_p2)   ;;  %645 = vmatpush1.bf16.msra.mxu1 (!%p223_p2), %v869_v11  ;;  %v878_v20 = vld [vmem:[%s1079_s4 + $0x10] sm:$0xff] (!%p223_p2)   ;;  %v880_v21 = vld [vmem:[%s1079_s4 + $0x58] sm:$0xff] (!%p223_p2)   ;;  %s907_s19 = smov (!%p223_p2), 32   ;;  %vm398_vm3 = vcmask (!%p223_p2), 130048   ;;  %vm415_vm5 = vcmask (!%p223_p2), 261120  }
   0x9   : > { %v872_v14 = vld [vmem:[%s1079_s4] sm:$0xff] (!%p223_p2)   ;;  %646 = vmatprep.subr.bf16.mxu1 (!%p223_p2), %v904_v13  ;;  %809 = vmatprep.subr.bf16.mxu0 (!%p223_p2), %v871_v12  ;;  %v876_v22 = vld [vmem:[%s1079_s4 + $0x98] sm:$0xff] (!%p223_p2)   ;;  %v886_v27 = vld [vmem:[%s1079_s4 + $0x68] sm:$0xff] (!%p223_p2)   ;;  %vm908_vm6 = vmmov (!%p223_p2), 1   ;;  %vm599_vm8 = vcmask (!%p223_p2), 392192  }
   0xa   : > { %810 = vmatpush3.bf16.msra.mxu0 (!%p223_p2), %v872_v14  ;;  %v879_v23 = vld [vmem:[%s1079_s4 + $0xa0] sm:$0xff] (!%p223_p2)   ;;  %v881_v24 = vld [vmem:[%s1079_s4 + $0x18] sm:$0xff] (!%p223_p2)   ;;  %v882_v28 = vld [vmem:[%s1079_s4 + $0xa8] sm:$0xff] (!%p223_p2)  }
   0xb   : > { %811 = vmatprep.subr.bf16.mxu0 (!%p223_p2), %v874_v15  ;;  %v883_v25 = vld [vmem:[%s1079_s4 + $0x60] sm:$0xff] (!%p223_p2)   ;;  %v887_v29 = vld [vmem:[%s1079_s4 + $0x28] sm:$0xff] (!%p223_p2)   ;;  %v889_v30 = vld [vmem:[%s1079_s4 + $0x70] sm:$0xff] (!%p223_p2)  }
   0xc   : > { %647 = vmatpush1.bf16.msra.mxu1 (!%p223_p2), %v870_v16  ;;  %v884_v26 = vld [vmem:[%s1079_s4 + $0x20] sm:$0xff] (!%p223_p2)   ;;  %v885_v31 = vld [vmem:[%s1079_s4 + $0xb0] sm:$0xff] (!%p223_p2)   ;;  %v888_v33 = vld [vmem:[%s1079_s4 + $0xb8] sm:$0xff] (!%p223_p2)  }
   0xd   : > { %s1083_s22 = smov (!%p257_p3, %s758_s22), 1  ;;  %648 = vmatprep.subr.bf16.mxu1 %v904_v13  ;;  %v890_v32 = vld [vmem:[%s1079_s4 + $0x30] sm:$0xff]   ;;  %v891_v34 = vld [vmem:[%s1079_s4 + $0xc0] sm:$0xff]   ;;  %v892_v35 = vld [vmem:[%s1079_s4 + $0x78] sm:$0xff]  }
   0xe   : > { %s955_s25 = sshll.u32 %s1083_s22, 4  ;;  %812 = vmatpush3.bf16.msra.mxu0 %v875_v17  ;;  %v893_v36 = vld [vmem:[%s1079_s4 + $0x38] sm:$0xff]   ;;  %v894_v37 = vld [vmem:[%s1079_s4 + $0xc8] sm:$0xff]   ;;  %v895_v39 = vld [vmem:[%s1079_s4 + $0xd0] sm:$0xff]  }
   0xf   : > { %s261_s30 = scalar_lea.vmem %s1075_s0, %s955_s25  ;;  %813 = vmatprep.subr.bf16.mxu0 %v877_v18  ;;  %vm799_vm4 = vmneg %vm366_vm2  ;;  %s266_s26 = scalar_lea.vmem %s1076_s1, %s955_s25 }
  0x10   : > { %v273_v2 = vld [vmem:[%s261_s30] sm:$0xff]  ;;  %v274_v3 = vld [vmem:[%s261_s30 + $0x8] sm:$0xff]  ;;  %649 = vmatpush1.bf16.msra.mxu1 %v873_v19  ;;  %vm800_vm7 = vmpackc.low %vm908_vm6, %vm799_vm4  ;;  %s271_s29 = scalar_lea.vmem %s1081_s6, %s955_s25 }
  0x11   : > { %v337_v4 = vmul.f32 %v769_v0, %v273_v2  ;;  %v338_v5 = vmul.f32 %v769_v0, %v274_v3  ;;  %650 = vmatprep.subr.bf16.mxu1 %v904_v13 }
  0x12   : > { %814 = vmatpush3.bf16.msra.mxu0 %v878_v20 }
  0x13   : > { %v345_v6 = vadd.f32 %v770_v1, %v337_v4  ;;  %v346_v7 = vadd.f32 %v770_v1, %v338_v5  ;;  %815 = vmatprep.subr.bf16.mxu0 %v880_v21 }
  0x14   : > { %651 = vmatpush1.bf16.msra.mxu1 %v876_v22 }
  0x15   : > { %v347_v8 = vmax.f32 %v345_v6, 0.0  ;;  %v348_v9 = vmax.f32 %v346_v7, 0.0  ;;  %652 = vmatprep.subr.bf16.mxu1 %v904_v13 }
  0x16   : > { %816 = vmatpush3.bf16.msra.mxu0 %v881_v24 }
  0x17   : > { %v844_v10 = vpack.i.bf16 %v348_v9, %v347_v8  ;;  %817 = vmatprep.subr.bf16.mxu0 %v883_v25 }
  0x18   : > { %653 = vmatpush1.bf16.msra.mxu1 %v879_v23 }
  0x19   : > { %845 = vrot.lane.b32.xlu0 %v844_v10, %s905_s15  ;;  %654 = vmatprep.subr.bf16.mxu1 %v904_v13 }
  0x1a   : > { %818 = vmatpush3.bf16.msra.mxu0 %v884_v26 }
  0x1b   : > { %819 = vmatprep.subr.bf16.mxu0 %v886_v27  ;;  %v771_v27 = vld [vmem:[%s1080_s5] ss:$0 sm:$0xff] }
  0x1c   : > { %655 = vmatpush1.bf16.msra.mxu1 %v882_v28 }
  0x1d   : > { %656 = vmatprep.subr.bf16.mxu1 %v904_v13 }
  0x1e   : > { %820 = vmatpush3.bf16.msra.mxu0 %v887_v29 }
  0x1f   : > { %821 = vmatprep.subr.bf16.mxu0 %v889_v30 }
  0x20   : > { %657 = vmatpush1.bf16.msra.mxu1 %v885_v31 }
  0x21   : > { %658 = vmatprep.subr.bf16.mxu1 %v904_v13 }
  0x22   : > { %822 = vmatpush3.bf16.msra.mxu0 %v890_v32 }
  0x23   : > { %823 = vmatprep.subr.bf16.mxu0 %v892_v35 }
  0x24   : > { %659 = vmatpush1.bf16.msra.mxu1 %v888_v33 }
  0x25   : > { %660 = vmatprep.subr.bf16.mxu1 %v904_v13 }
  0x26   : > { %824 = vmatpush3.bf16.msra.mxu0 %v893_v36 }
  0x28   : > { %661 = vmatpush1.bf16.msra.mxu1 %v891_v34  ;;  %v685_v34 = vld [vmem:[%s266_s26] sm:$0xff] }
  0x29   : > { %662 = vmatprep.subr.bf16.mxu1 %v904_v13 }
  0x2c   : > { %663 = vmatpush1.bf16.msra.mxu1 %v894_v37 }
  0x2d   : > { %664 = vmatprep.subr.bf16.mxu1 %v904_v13 }
  0x30   : > { %665 = vmatpush1.bf16.msra.mxu1 %v895_v39  ;;  %v686_v39 = vld [vmem:[%s266_s26 + $0x8] sm:$0xff] }
  0x8b   : > { %v846_v38 = vpop.permute.xlu0 %845 }
  0x8c   : > { %v848_v40 = vunpack.i.h.bf16 %v846_v38  ;;  %v847_v41 = vunpack.i.l.bf16 %v846_v38 }
  0x8e   : > { %v359_v42 = vsel %vm357_vm0, 0.0, %v848_v40  ;;  %v358_v43 = vsel %vm357_vm0, 0.0, %v847_v41  ;;  %v360_v44 = vsel %vm357_vm0, %v847_v41, 0.0  ;;  %v361_v45 = vsel %vm357_vm0, %v848_v40, 0.0 }
  0x8f   : > { %v369_v46 = vrot.slane %v359_v42, 7  ;;  %v381_v47 = vrot.slane %v359_v42, 1  ;;  %v367_v48 = vrot.slane %v358_v43, 7  ;;  %v380_v49 = vrot.slane %v358_v43, 1 }
  0x90   : > { %v371_v50 = vrot.slane %v361_v45, 7  ;;  %v384_v51 = vrot.slane %v361_v45, 1  ;;  %v854_v52 = vpack.i.bf16 %v361_v45, %v360_v44  ;;  %v383_v53 = vrot.slane %v360_v44, 1 }
  0x91   : > { %v849_v54 = vpack.i.bf16 %v359_v42, %v358_v43  ;;  %v388_v55 = vsel %vm379_vm1, %v381_v47, 0.0  ;;  %v382_v56 = vsel %vm379_vm1, %v380_v49, %v381_v47  ;;  %v368_v57 = vrot.slane %v360_v44, 7 }
  0x92   : > { %855 = vrot.lane.b32.xlu1 %v854_v52, %s906_s18  ;;  %v389_v58 = vsel %vm379_vm1, %v384_v51, 0.0  ;;  %v385_v59 = vsel %vm379_vm1, %v383_v53, %v384_v51  ;;  %v370_v60 = vsel %vm366_vm2, %v367_v48, %v369_v46 }
  0x93   : > { %850 = vrot.lane.b32.xlu0 %v849_v54, %s906_s18  ;;  %v864_v61 = vpack.i.bf16 %v389_v58, %v388_v55  ;;  %v859_v62 = vpack.i.bf16 %v385_v59, %v382_v56  ;;  %v372_v63 = vsel %vm366_vm2, %v368_v57, %v371_v50  ;;  %v801_v0 = vpack.c.bf16 %v370_v60, %v367_v48 }
  0x94   : > { %v378_v7 = vsel %vm366_vm2, 0.0, %v368_v57 }
  0x96   : > { %860 = vrot.lane.b32.xlu1 %v859_v62, %s907_s19 }
  0x97   : > { %865 = vrot.lane.b32.xlu0 %v864_v61, %s907_s19 }
 0x104   : > { %v856_v1 = vpop.permute.xlu1 %855 }
 0x105   : > { %v851_v2 = vpop.permute.xlu0 %850  ;;  %v857_v3 = vunpack.i.l.bf16 %v856_v1  ;;  %v858_v6 = vunpack.i.h.bf16 %v856_v1 }
 0x106   : > { %v853_v4 = vunpack.i.h.bf16 %v851_v2  ;;  %v852_v5 = vunpack.i.l.bf16 %v851_v2 }
 0x108   : > { %v861_v8 = vpop.permute.xlu1 %860  ;;  %v422_v9 = vsel %vm398_vm3, %v378_v7, %v852_v5  ;;  %v423_v10 = vsel %vm398_vm3, %v372_v63, %v853_v4  ;;  %v399_v17 = vsel %vm398_vm3, %v852_v5, %v857_v3  ;;  %v400_v19 = vsel %vm398_vm3, %v853_v4, %v858_v6 }
 0x109   : > { %v866_v11 = vpop.permute.xlu0 %865  ;;  %v863_v12 = vunpack.i.h.bf16 %v861_v8  ;;  %v862_v13 = vunpack.i.l.bf16 %v861_v8  ;;  %v427_v14 = vpack.c.bf16 %v423_v10, %v422_v9 }
 0x10a   : > { %v868_v15 = vunpack.i.h.bf16 %v866_v11  ;;  %v867_v16 = vunpack.i.l.bf16 %v866_v11 }
 0x10b   : > { %635 = vmatprep.mubr.bf16.mxu0 %v427_v14  ;;  %v416_v18 = vsel %vm415_vm5, %v862_v13, %v863_v12  ;;  %v424_v20 = vsel %vm415_vm5, %v399_v17, %v862_v13 }
 0x10c   : > { %802 = vmatmul.mubr.msk.bf16.vlgmr.msra.gmra.mrb[0].mxu0 %vm800_vm7, %v801_v0  ;;  %v417_v21 = vsel %vm415_vm5, %v867_v16, %v868_v15  ;;  %v425_v22 = vsel %vm415_vm5, %v400_v19, %v867_v16 }
 0x10d   : > { %v429_v23 = vpack.c.bf16 %v417_v21, %v416_v18  ;;  %v428_v24 = vpack.c.bf16 %v425_v22, %v424_v20 }
 0x10f   : > { %803 = vmatprep.mubr.msk.bf16.mxu1 %vm599_vm8, %v429_v23 }
 0x110   : > { %677 = vmatmul.mubr.bf16.vlgmr.msra.gmra.mrb[0].mxu1 %v428_v24 }
 0x1df   : > { %v825_v25 = vpop.f32.mrb[0].mxu0 }
 0x1e0   : > { %v826_v26 = vpop.f32.mrb[1].mxu0 }
 0x1e1   : > { %v827_v28 = vadd.f32 %v826_v26, %v825_v25  ;;  %v828_v29 = vpop.f32.mrb[2].mxu0 }
 0x1e2   : > { %v829_v30 = vpop.f32.mrb[3].mxu0 }
 0x1e3   : > { %v830_v31 = vadd.f32 %v829_v30, %v828_v29  ;;  %v638_v32 = vadd.f32 %v827_v28, %v771_v27  ;;  %v678_v33 = vpop.f32.mrb[0].mxu1 }
 0x1e4   : > { %v680_v35 = vpop.f32.mrb[1].mxu1 }
 0x1e5   : > { %v679_v36 = vadd.f32 %v678_v33, %v638_v32  ;;  %v641_v37 = vadd.f32 %v830_v31, %v771_v27  ;;  %v681_v38 = vpop.f32.mrb[2].mxu1 }
 0x1e6   : > { %v683_v40 = vpop.f32.mrb[3].mxu1 }
 0x1e7   : > { %v687_v41 = vadd.f32 %v685_v34, %v679_v36  ;;  %v682_v42 = vadd.f32 %v681_v38, %v641_v37 }
 0x1e9   : > { %689 = vst [vmem:[%s271_s29] sm:$0xff] %v687_v41  ;;  %v688_v43 = vadd.f32 %v686_v39, %v682_v42 }
 0x1eb   : > { %690 = vst [vmem:[%s271_s29 + $0x8] sm:$0xff] %v688_v43 }
 0x1ec PF: > { %s16_s21 = sadd.s32 1, %s902_s21  }
 0x1ed   : > { %p13_p4 = scmp.ge.s32.totalorder %s16_s21, 4  }
 0x1ef   :  { %15 = sbr.rel (!%p13_p4) target bundleno = 1 (0x1), region = 77 }

</bundles_post_ra>
